<compile_context>
chip_gen: v7x
topology: tpu7x:2x2x1
jax: 0.10.0
libtpu: 0.0.40
codegen_flags: <defaults>
</compile_context>

<pallas_src>
import functools
import math

import jax
import jax.numpy as jnp
from jax.experimental import pallas as pl
from jax.experimental.pallas import tpu as pltpu

COMPUTE_DTYPE = jnp.bfloat16    # MXU-native operand dtype; accumulation is always f32
BLOCK_M = 512                   # row tile for the fused LN / linear kernels
BLOCK_Q = 128                   # query tile for flash attention
BLOCK_KV = 256                  # kv tile for flash attention


def _vmem_limit_bytes():
    """~80% of physical VMEM (v7x: ~51 MiB of 64, v5e/v6e: ~102 MiB of 128); 48 MiB fallback."""
    try:
        cap = getattr(pltpu.get_tpu_info(), "vmem_capacity_bytes", None)
        if cap:
            return int(cap) * 4 // 5
    except Exception:
        pass
    return 48 * 1024 * 1024


VMEM_LIMIT = _vmem_limit_bytes()


def _pick_block(n, target, align):
    """Largest divisor of n that is <= target and a multiple of `align`; else n (full dim)."""
    if n <= target:
        return n
    b = (target // align) * align
    while b >= align:
        if n % b == 0:
            return b
        b -= align
    return n


def _ln_f32(x, gamma, beta, eps):
    mu = jnp.mean(x, axis=-1, keepdims=True)
    var = jnp.mean(jnp.square(x - mu), axis=-1, keepdims=True)
    return (x - mu) * jax.lax.rsqrt(var + eps) * gamma + beta


# ------------------------------ kernels ------------------------------------

def _ln_qkv_kernel(x_ref, pos_ref, g_ref, b_ref, wqk_ref, bqk_ref, wv_ref, bv_ref,
                   q_ref, k_ref, v_ref, *, eps, e):
    """Fused LayerNorm1 + (xn + pos) -> joint QK proj, xn -> V proj; three lane-dense outputs."""
    x = x_ref[...].astype(jnp.float32)
    xn = _ln_f32(x, g_ref[...], b_ref[...], eps)
    qk_in = (xn + pos_ref[...].astype(jnp.float32)).astype(wqk_ref.dtype)     # bf16 MXU operand
    qk = jnp.dot(qk_in, wqk_ref[...], preferred_element_type=jnp.float32) + bqk_ref[...]
    v = jnp.dot(xn.astype(wv_ref.dtype), wv_ref[...],
                preferred_element_type=jnp.float32) + bv_ref[...]
    q_ref[...] = qk[:, :e].astype(q_ref.dtype)       # direct sliced stores (no concatenate)
    k_ref[...] = qk[:, e:].astype(k_ref.dtype)
    v_ref[...] = v.astype(v_ref.dtype)


def _ln_linear_relu_kernel(x_ref, g_ref, b_ref, w_ref, bias_ref, o_ref, *, eps):
    """Fused LayerNorm2 + MLP first linear + ReLU (bf16 matmul, f32 accumulation)."""
    x = x_ref[...].astype(jnp.float32)
    xn = _ln_f32(x, g_ref[...], b_ref[...], eps)
    y = jnp.dot(xn.astype(w_ref.dtype), w_ref[...],
                preferred_element_type=jnp.float32) + bias_ref[...]
    o_ref[...] = jnp.maximum(y, 0.0).astype(o_ref.dtype)


def _linear_residual_kernel(x_ref, w_ref, bias_ref, res_ref, o_ref):
    """y = x @ W + b + residual  (attention out-proj and MLP second linear)."""
    y = jnp.dot(x_ref[...].astype(w_ref.dtype), w_ref[...],
                preferred_element_type=jnp.float32)
    y = y + bias_ref[...] + res_ref[...].astype(jnp.float32)
    o_ref[...] = y.astype(o_ref.dtype)


def _layernorm_kernel(x_ref, g_ref, b_ref, o_ref, *, eps):
    x = x_ref[...].astype(jnp.float32)
    o_ref[...] = _ln_f32(x, g_ref[...], b_ref[...], eps).astype(o_ref.dtype)


def _flash_attn_kernel(*refs, num_heads, head_dim, has_mask):
    """Online-softmax attention.  One grid step = one (q-block, batch) pair, ALL heads,
    lane-dense (bq, E)/(bk, E) loads and a lane-dense (bq, E) output store.
    Grid axes: (q-block, batch, kv-block) with kv innermost ("arbitrary")."""
    if has_mask:
        q_ref, k_ref, v_ref, b_ref, o_ref, m_sc, l_sc, acc_sc = refs
    else:
        q_ref, k_ref, v_ref, o_ref, m_sc, l_sc, acc_sc = refs
        b_ref = None

    ki = pl.program_id(2)

    @pl.when(ki == 0)
    def _():
        m_sc[...] = jnp.full_like(m_sc, -1e30)
        l_sc[...] = jnp.zeros_like(l_sc)
        acc_sc[...] = jnp.zeros_like(acc_sc)

    q = q_ref[0]                                  # (bq, E) bf16; 1/sqrt(Dh) folded into w_qk
    k = k_ref[0]                                  # (bk, E) bf16
    v = v_ref[0]                                  # (bk, E) bf16
    bias = b_ref[0] if has_mask else None         # (1, bk) f32 additive key-padding bias

    for h in range(num_heads):                    # static unroll over heads
        sl = slice(h * head_dim, (h + 1) * head_dim)
        s = jax.lax.dot_general(q[:, sl], k[:, sl], (((1,), (1,)), ((), ())),
                                preferred_element_type=jnp.float32)          # (bq, bk)
        if has_mask:
            s = s + bias
        m_prev = m_sc[:, h:h + 1]
        m_new = jnp.maximum(m_prev, jnp.max(s, axis=-1, keepdims=True))
        alpha = jnp.exp(m_prev - m_new)
        p = jnp.exp(s - m_new)
        l_sc[:, h:h + 1] = alpha * l_sc[:, h:h + 1] + jnp.sum(p, axis=-1, keepdims=True)
        acc_sc[:, sl] = alpha * acc_sc[:, sl] + jnp.dot(
            p.astype(v.dtype), v[:, sl], preferred_element_type=jnp.float32)
        m_sc[:, h:h + 1] = m_new

    @pl.when(ki == pl.num_programs(2) - 1)
    def _():
        for h in range(num_heads):
            sl = slice(h * head_dim, (h + 1) * head_dim)
            inv = pl.reciprocal(l_sc[:, h:h + 1], approx=False)   # exact divide for parity
            o_ref[0, :, sl] = (acc_sc[:, sl] * inv).astype(o_ref.dtype)


# ------------------------------ wrappers ------------------------------------

def ln_qkv_proj(x2d, pos2d, gamma, beta, w_qk, b_qk, w_v, b_v, eps,
                block_m=BLOCK_M, out_dtype=COMPUTE_DTYPE):
    M, E = x2d.shape
    bm = _pick_block(M, block_m, 8)
    flops = 6 * M * E * E
    bytes_acc = 4 * 2 * M * E + 2 * (3 * E * E + 3 * M * E)
    return pl.pallas_call(
        functools.partial(_ln_qkv_kernel, eps=eps, e=E),
        out_shape=(jax.ShapeDtypeStruct((M, E), out_dtype),) * 3,
        grid=(M // bm,),
        in_specs=[
            pl.BlockSpec((bm, E), lambda i: (i, 0)),
            pl.BlockSpec((bm, E), lambda i: (i, 0)),
            pl.BlockSpec((1, E), lambda i: (0, 0)),
            pl.BlockSpec((1, E), lambda i: (0, 0)),
            pl.BlockSpec((E, 2 * E), lambda i: (0, 0)),      # resident bf16 QK weight
            pl.BlockSpec((1, 2 * E), lambda i: (0, 0)),
            pl.BlockSpec((E, E), lambda i: (0, 0)),          # resident bf16 V weight
            pl.BlockSpec((1, E), lambda i: (0, 0)),
        ],
        out_specs=(pl.BlockSpec((bm, E), lambda i: (i, 0)),) * 3,
        compiler_params=pltpu.CompilerParams(
            dimension_semantics=("parallel",), vmem_limit_bytes=VMEM_LIMIT),
        cost_estimate=pl.CostEstimate(flops=int(flops), transcendentals=int(M),
                                      bytes_accessed=int(bytes_acc)),
    )(x2d, pos2d, gamma.reshape(1, E), beta.reshape(1, E),
      w_qk, b_qk.reshape(1, 2 * E), w_v, b_v.reshape(1, E))


def ln_linear_relu(x2d, gamma, beta, w, b, eps, block_m=BLOCK_M, out_dtype=COMPUTE_DTYPE):
    M, E = x2d.shape
    N = w.shape[1]
    bm = _pick_block(M, block_m, 8)
    # TODO(synk): for E >= 1024 configs on v7x, tile the N (output-column) axis as a second grid dim.
    return pl.pallas_call(
        functools.partial(_ln_linear_relu_kernel, eps=eps),
        out_shape=jax.ShapeDtypeStruct((M, N), out_dtype),
        grid=(M // bm,),
        in_specs=[
            pl.BlockSpec((bm, E), lambda i: (i, 0)),
            pl.BlockSpec((1, E), lambda i: (0, 0)),
            pl.BlockSpec((1, E), lambda i: (0, 0)),
            pl.BlockSpec((E, N), lambda i: (0, 0)),          # resident bf16 weight
            pl.BlockSpec((1, N), lambda i: (0, 0)),
        ],
        out_specs=pl.BlockSpec((bm, N), lambda i: (i, 0)),
        compiler_params=pltpu.CompilerParams(
            dimension_semantics=("parallel",), vmem_limit_bytes=VMEM_LIMIT),
        cost_estimate=pl.CostEstimate(flops=int(2 * M * E * N), transcendentals=int(M),
                                      bytes_accessed=int(4 * M * E + 2 * (E * N + M * N))),
    )(x2d, gamma.reshape(1, E), beta.reshape(1, E), w, b.reshape(1, N))


def linear_residual(x2d, w, b, res2d, block_m=BLOCK_M):
    M, K = x2d.shape
    N = w.shape[1]
    bm = _pick_block(M, block_m, 8)
    return pl.pallas_call(
        _linear_residual_kernel,
        out_shape=jax.ShapeDtypeStruct((M, N), res2d.dtype),
        grid=(M // bm,),
        in_specs=[
            pl.BlockSpec((bm, K), lambda i: (i, 0)),
            pl.BlockSpec((K, N), lambda i: (0, 0)),          # resident bf16 weight
            pl.BlockSpec((1, N), lambda i: (0, 0)),
            pl.BlockSpec((bm, N), lambda i: (i, 0)),
        ],
        out_specs=pl.BlockSpec((bm, N), lambda i: (i, 0)),
        compiler_params=pltpu.CompilerParams(
            dimension_semantics=("parallel",), vmem_limit_bytes=VMEM_LIMIT),
        cost_estimate=pl.CostEstimate(flops=int(2 * M * K * N), transcendentals=0,
                                      bytes_accessed=int(2 * (M * K + K * N) + 2 * 4 * M * N)),
    )(x2d, w, b.reshape(1, N), res2d)


def layernorm(x2d, gamma, beta, eps, block_m=BLOCK_M):
    M, E = x2d.shape
    bm = _pick_block(M, block_m, 8)
    return pl.pallas_call(
        functools.partial(_layernorm_kernel, eps=eps),
        out_shape=jax.ShapeDtypeStruct((M, E), x2d.dtype),
        grid=(M // bm,),
        in_specs=[
            pl.BlockSpec((bm, E), lambda i: (i, 0)),
            pl.BlockSpec((1, E), lambda i: (0, 0)),
            pl.BlockSpec((1, E), lambda i: (0, 0)),
        ],
        out_specs=pl.BlockSpec((bm, E), lambda i: (i, 0)),
        compiler_params=pltpu.CompilerParams(
            dimension_semantics=("parallel",), vmem_limit_bytes=VMEM_LIMIT),
    )(x2d, gamma.reshape(1, E), beta.reshape(1, E))


def flash_attention(q, k, v, bias, *, num_heads, head_dim,
                    block_q=BLOCK_Q, block_kv=BLOCK_KV, out_dtype=COMPUTE_DTYPE):
    # q, k, v: (B, L, E) bf16 (row-major per batch).  bias: (B, 1, L) additive f32 key bias or None.
    B, L, E = q.shape
    bq = _pick_block(L, block_q, 8)
    bk = _pick_block(L, block_kv, 128)
    nq, nk = L // bq, L // bk
    has_mask = bias is not None

    in_specs = [
        pl.BlockSpec((1, bq, E), lambda qi, b, ki: (b, qi, 0)),     # q resident across kv axis
        pl.BlockSpec((1, bk, E), lambda qi, b, ki: (b, ki, 0)),
        pl.BlockSpec((1, bk, E), lambda qi, b, ki: (b, ki, 0)),
    ]
    args = [q, k, v]
    if has_mask:
        in_specs.append(pl.BlockSpec((1, 1, bk), lambda qi, b, ki: (b, 0, ki)))
        args.append(bias)

    return pl.pallas_call(
        functools.partial(_flash_attn_kernel, num_heads=num_heads,
                          head_dim=head_dim, has_mask=has_mask),
        out_shape=jax.ShapeDtypeStruct((B, L, E), out_dtype),
        grid=(nq, B, nk),                       # q-block leading => megacore split even at B=1
        in_specs=in_specs,
        out_specs=pl.BlockSpec((1, bq, E), lambda qi, b, ki: (b, qi, 0)),
        scratch_shapes=[
            pltpu.VMEM((bq, num_heads), jnp.float32),     # running max, per head
            pltpu.VMEM((bq, num_heads), jnp.float32),     # running sum, per head
            pltpu.VMEM((bq, E), jnp.float32),             # output accumulator, all heads
        ],
        compiler_params=pltpu.CompilerParams(
            dimension_semantics=("parallel", "parallel", "arbitrary"),
            vmem_limit_bytes=VMEM_LIMIT),
        cost_estimate=pl.CostEstimate(flops=int(4 * B * L * L * E),
                                      transcendentals=int(B * num_heads * L * L),
                                      bytes_accessed=int(2 * 4 * B * L * E)),
    )(*args)


# ------------------------------ encoder glue (plain JAX, no per-layer transposes) ----------

def encoder_layer(x2d, pos2d, bias, p, B, L, num_heads, eps):
    # norm_first=True branch of TransformerEncoderLayer; dropout == identity.
    M, E = x2d.shape
    H = num_heads
    Dh = E // H

    # 1. LN1 + QKV projection (q/k from src_norm + pos, v from src_norm) -> three (M, E) bf16 slabs
    q2d, k2d, v2d = ln_qkv_proj(x2d, pos2d, p["g1"], p["b1"],
                                p["attn"]["w_qk"], p["attn"]["b_qk"],
                                p["attn"]["w_v"], p["attn"]["b_v"], eps)

    # 2. flash attention, all heads fused in-kernel; (M,E)->(B,L,E) reshapes are free views
    attn = flash_attention(q2d.reshape(B, L, E), k2d.reshape(B, L, E), v2d.reshape(B, L, E),
                           bias, num_heads=H, head_dim=Dh)
    attn2d = attn.reshape(M, E)

    # 3. out-projection + residual add (f32 residual stream)
    x2d = linear_residual(attn2d, p["attn"]["w_out"], p["attn"]["b_out"], x2d)

    # 4. LN2 + MLP (linear1+ReLU fused, linear2+residual fused)
    h = ln_linear_relu(x2d, p["g2"], p["b2"], p["mlp_w1"], p["mlp_b1"], eps)
    x2d = linear_residual(h, p["mlp_w2"], p["mlp_b2"], x2d)
    return x2d


def transformer_encoder(src, pos_emb, src_mask, src_key_padding_mask, params, *, num_heads, eps):
    # TODO(synk): src_mask (attn_mask) not supported — it would be one more additive (L, L) bias input.
    assert src_mask is None
    L, B, E = src.shape
    # single (L,B,E)<->(B,L,E) transpose for the WHOLE encoder; all per-layer head splitting is
    # done by BlockSpec index_maps / free reshapes (no per-layer XLA transposes).
    x2d = jnp.transpose(src, (1, 0, 2)).reshape(B * L, E)
    pos2d = jnp.transpose(pos_emb, (1, 0, 2)).reshape(B * L, E)

    if src_key_padding_mask is not None:
        bias = jnp.where(src_key_padding_mask, -1e9, 0.0).astype(jnp.float32).reshape(B, 1, L)
    else:
        bias = None

    for p in params["layers"]:
        x2d = encoder_layer(x2d, pos2d, bias, p, B, L, num_heads, eps)

    x2d = layernorm(x2d, params["gf"], params["bf"], eps)
    return jnp.transpose(x2d.reshape(B, L, E), (1, 0, 2))


# ------------------------------ params -------------------------------------

def init_params(key, num_layers, emb_dim, mlp_factor):
    """torch-like f32 parameters (w_in is the fused (E, 3E) in-projection, columns [Q|K|V])."""
    hidden = mlp_factor * emb_dim
    layers = []
    for i in range(num_layers):
        k = jax.random.fold_in(key, i)
        ks = jax.random.split(k, 4)
        layers.append(dict(
            g1=jnp.ones((emb_dim,), jnp.float32),
            b1=jnp.zeros((emb_dim,), jnp.float32),
            g2=jnp.ones((emb_dim,), jnp.float32),
            b2=jnp.zeros((emb_dim,), jnp.float32),
            attn=dict(
                w_in=0.02 * jax.random.normal(ks[0], (emb_dim, 3 * emb_dim), jnp.float32),
                b_in=jnp.zeros((3 * emb_dim,), jnp.float32),
                w_out=0.02 * jax.random.normal(ks[1], (emb_dim, emb_dim), jnp.float32),
                b_out=jnp.zeros((emb_dim,), jnp.float32),
            ),
            mlp_w1=0.02 * jax.random.normal(ks[2], (emb_dim, hidden), jnp.float32),
            mlp_b1=jnp.zeros((hidden,), jnp.float32),
            mlp_w2=0.02 * jax.random.normal(ks[3], (hidden, emb_dim), jnp.float32),
            mlp_b2=jnp.zeros((emb_dim,), jnp.float32),
        ))
    return dict(
        layers=layers,
        gf=jnp.ones((emb_dim,), jnp.float32),
        bf=jnp.zeros((emb_dim,), jnp.float32),
    )


def prepare_params(params, num_heads, compute_dtype=COMPUTE_DTYPE):
    """Split the fused in-projection, fold 1/sqrt(Dh) into the Q columns, cast weights to bf16."""
    new_layers = []
    for p in params["layers"]:
        w_in = p["attn"]["w_in"]
        b_in = p["attn"]["b_in"]
        E = w_in.shape[0]
        dh = E // num_heads
        scale = 1.0 / math.sqrt(dh)
        w_qk = jnp.concatenate([w_in[:, :E] * scale, w_in[:, E:2 * E]], axis=1)
        b_qk = jnp.concatenate([b_in[:E] * scale, b_in[E:2 * E]])
        new_layers.append(dict(
            g1=p["g1"].astype(jnp.float32), b1=p["b1"].astype(jnp.float32),
            g2=p["g2"].astype(jnp.float32), b2=p["b2"].astype(jnp.float32),
            attn=dict(
                w_qk=w_qk.astype(compute_dtype),
                b_qk=b_qk.astype(jnp.float32),
                w_v=w_in[:, 2 * E:].astype(compute_dtype),
                b_v=b_in[2 * E:].astype(jnp.float32),
                w_out=p["attn"]["w_out"].astype(compute_dtype),
                b_out=p["attn"]["b_out"].astype(jnp.float32),
            ),
            mlp_w1=p["mlp_w1"].astype(compute_dtype),
            mlp_b1=p["mlp_b1"].astype(jnp.float32),
            mlp_w2=p["mlp_w2"].astype(compute_dtype),
            mlp_b2=p["mlp_b2"].astype(jnp.float32),
        ))
    return dict(layers=new_layers,
                gf=params["gf"].astype(jnp.float32),
                bf=params["bf"].astype(jnp.float32))


# ------------------------------ main ----------------------------------------

if __name__ == "__main__":
    # Small config: 2 layers, emb_dim=64, heads=4 (Dh=16), mlp_factor=4, seq L=16, batch B=2
    num_layers, emb_dim, num_heads, mlp_factor = 2, 64, 4, 4
    eps = 1e-5
    L, B = 16, 2

    key = jax.random.PRNGKey(0)
    k_src, k_pos, k_par = jax.random.split(key, 3)
    src = jax.random.normal(k_src, (L, B, emb_dim), jnp.float32)
    pos_emb = jax.random.normal(k_pos, (L, B, emb_dim), jnp.float32)
    # pad the last three keys of batch element 1 to exercise the mask path
    key_padding_mask = jnp.zeros((B, L), jnp.bool_).at[1, L - 3:].set(True)

    params = prepare_params(init_params(k_par, num_layers, emb_dim, mlp_factor),
                            num_heads=num_heads)

    fwd = jax.jit(functools.partial(transformer_encoder, num_heads=num_heads, eps=eps))
    out = fwd(src, pos_emb, None, key_padding_mask, params)
    out = jax.block_until_ready(out)

    assert out.shape == (L, B, emb_dim)
    assert bool(jnp.all(jnp.isfinite(out)))
    print("KERNEL_OK")
</pallas_src>

<mosaic_0001>
module attributes {stable_mosaic.version = 11 : i64} {
  func.func @_ln_qkv_kernel(%arg0: i32, %arg1: memref<32x64xf32, #tpu.memory_space<vmem>>, %arg2: memref<32x64xf32, #tpu.memory_space<vmem>>, %arg3: memref<1x64xf32, #tpu.memory_space<vmem>>, %arg4: memref<1x64xf32, #tpu.memory_space<vmem>>, %arg5: memref<64x128xbf16, #tpu.memory_space<vmem>>, %arg6: memref<1x128xf32, #tpu.memory_space<vmem>>, %arg7: memref<64x64xbf16, #tpu.memory_space<vmem>>, %arg8: memref<1x64xf32, #tpu.memory_space<vmem>>, %arg9: memref<32x64xbf16, #tpu.memory_space<vmem>>, %arg10: memref<32x64xbf16, #tpu.memory_space<vmem>>, %arg11: memref<32x64xbf16, #tpu.memory_space<vmem>>) attributes {dimension_semantics = [#tpu.dimension_semantics<parallel>], iteration_bounds = array<i64: 1>, scalar_prefetch = 0 : i64, scratch_operands = 0 : i64, tpu.core_type = #tpu.core_type<tc>, window_params = [{transform_indices = @transform_0, window_bounds = array<i64: 32, 64>}, {transform_indices = @transform_1, window_bounds = array<i64: 32, 64>}, {pipeline_mode = #tpu.pipeline_mode<synchronous>, transform_indices = @transform_2, window_bounds = array<i64: 1, 64>}, {pipeline_mode = #tpu.pipeline_mode<synchronous>, transform_indices = @transform_3, window_bounds = array<i64: 1, 64>}, {pipeline_mode = #tpu.pipeline_mode<synchronous>, transform_indices = @transform_4, window_bounds = array<i64: 64, 128>}, {pipeline_mode = #tpu.pipeline_mode<synchronous>, transform_indices = @transform_5, window_bounds = array<i64: 1, 128>}, {pipeline_mode = #tpu.pipeline_mode<synchronous>, transform_indices = @transform_6, window_bounds = array<i64: 64, 64>}, {pipeline_mode = #tpu.pipeline_mode<synchronous>, transform_indices = @transform_7, window_bounds = array<i64: 1, 64>}, {transform_indices = @transform_8, window_bounds = array<i64: 32, 64>}, {transform_indices = @transform_9, window_bounds = array<i64: 32, 64>}, {transform_indices = @transform_10, window_bounds = array<i64: 32, 64>}]} {
    %c0 = arith.constant 0 : index
    %c0_0 = arith.constant 0 : index
    %0 = vector.load %arg1[%c0, %c0_0] : memref<32x64xf32, #tpu.memory_space<vmem>>, vector<32x64xf32>
    %c0_1 = arith.constant 0 : index
    %c0_2 = arith.constant 0 : index
    %1 = vector.load %arg3[%c0_1, %c0_2] : memref<1x64xf32, #tpu.memory_space<vmem>>, vector<1x64xf32>
    %c0_3 = arith.constant 0 : index
    %c0_4 = arith.constant 0 : index
    %2 = vector.load %arg4[%c0_3, %c0_4] : memref<1x64xf32, #tpu.memory_space<vmem>>, vector<1x64xf32>
    %cst = arith.constant dense<0.000000e+00> : vector<32xf32>
    %3 = vector.multi_reduction <add>, %0, %cst [1] : vector<32x64xf32> to vector<32xf32>
    %4 = vector.shape_cast %3 : vector<32xf32> to vector<32x1xf32>
    %cst_5 = arith.constant 6.400000e+01 : f32
    %5 = vector.broadcast %cst_5 : f32 to vector<32x1xf32>
    %6 = arith.divf %4, %5 : vector<32x1xf32>
    %7 = vector.broadcast %6 : vector<32x1xf32> to vector<32x64xf32>
    %8 = arith.subf %0, %7 : vector<32x64xf32>
    %9 = arith.mulf %8, %8 : vector<32x64xf32>
    %cst_6 = arith.constant dense<0.000000e+00> : vector<32xf32>
    %10 = vector.multi_reduction <add>, %9, %cst_6 [1] : vector<32x64xf32> to vector<32xf32>
    %11 = vector.shape_cast %10 : vector<32xf32> to vector<32x1xf32>
    %cst_7 = arith.constant 6.400000e+01 : f32
    %12 = vector.broadcast %cst_7 : f32 to vector<32x1xf32>
    %13 = arith.divf %11, %12 : vector<32x1xf32>
    %14 = vector.broadcast %6 : vector<32x1xf32> to vector<32x64xf32>
    %15 = arith.subf %0, %14 : vector<32x64xf32>
    %cst_8 = arith.constant 9.99999974E-6 : f32
    %16 = vector.broadcast %cst_8 : f32 to vector<32x1xf32>
    %17 = arith.addf %13, %16 : vector<32x1xf32>
    %18 = math.rsqrt %17 : vector<32x1xf32>
    %19 = vector.broadcast %18 : vector<32x1xf32> to vector<32x64xf32>
    %20 = arith.mulf %15, %19 : vector<32x64xf32>
    %21 = vector.broadcast %1 : vector<1x64xf32> to vector<32x64xf32>
    %22 = arith.mulf %20, %21 : vector<32x64xf32>
    %23 = vector.broadcast %2 : vector<1x64xf32> to vector<32x64xf32>
    %24 = arith.addf %22, %23 : vector<32x64xf32>
    %c0_9 = arith.constant 0 : index
    %c0_10 = arith.constant 0 : index
    %25 = vector.load %arg2[%c0_9, %c0_10] : memref<32x64xf32, #tpu.memory_space<vmem>>, vector<32x64xf32>
    %26 = arith.addf %24, %25 : vector<32x64xf32>
    %27 = arith.truncf %26 : vector<32x64xf32> to vector<32x64xbf16>
    %c0_11 = arith.constant 0 : index
    %c0_12 = arith.constant 0 : index
    %28 = vector.load %arg5[%c0_11, %c0_12] : memref<64x128xbf16, #tpu.memory_space<vmem>>, vector<64x128xbf16>
    %cst_13 = arith.constant dense<0.000000e+00> : vector<32x128xf32>
    %29 = tpu.matmul %27, %28, %cst_13 {dimension_numbers = #tpu.dot_dimension_numbers<[1], [0], [0], [1], [0, 0, 1, 1], [], []>} : vector<32x64xbf16>, vector<64x128xbf16>, vector<32x128xf32> -> vector<32x128xf32>
    %c0_14 = arith.constant 0 : index
    %c0_15 = arith.constant 0 : index
    %30 = vector.load %arg6[%c0_14, %c0_15] : memref<1x128xf32, #tpu.memory_space<vmem>>, vector<1x128xf32>
    %31 = vector.broadcast %30 : vector<1x128xf32> to vector<32x128xf32>
    %32 = arith.addf %29, %31 : vector<32x128xf32>
    %33 = arith.truncf %24 : vector<32x64xf32> to vector<32x64xbf16>
    %c0_16 = arith.constant 0 : index
    %c0_17 = arith.constant 0 : index
    %34 = vector.load %arg7[%c0_16, %c0_17] : memref<64x64xbf16, #tpu.memory_space<vmem>>, vector<64x64xbf16>
    %cst_18 = arith.constant dense<0.000000e+00> : vector<32x64xf32>
    %35 = tpu.matmul %33, %34, %cst_18 {dimension_numbers = #tpu.dot_dimension_numbers<[1], [0], [0], [1], [0, 0, 1, 1], [], []>} : vector<32x64xbf16>, vector<64x64xbf16>, vector<32x64xf32> -> vector<32x64xf32>
    %c0_19 = arith.constant 0 : index
    %c0_20 = arith.constant 0 : index
    %36 = vector.load %arg8[%c0_19, %c0_20] : memref<1x64xf32, #tpu.memory_space<vmem>>, vector<1x64xf32>
    %37 = vector.broadcast %36 : vector<1x64xf32> to vector<32x64xf32>
    %38 = arith.addf %35, %37 : vector<32x64xf32>
    %39 = vector.extract_strided_slice %32 {offsets = [0, 0], sizes = [32, 64], strides = [1, 1]} : vector<32x128xf32> to vector<32x64xf32>
    %40 = arith.truncf %39 : vector<32x64xf32> to vector<32x64xbf16>
    %c0_21 = arith.constant 0 : index
    %c0_22 = arith.constant 0 : index
    %41 = vector.load %arg9[%c0_21, %c0_22] : memref<32x64xbf16, #tpu.memory_space<vmem>>, vector<32x64xbf16>
    tpu.vector_store %arg9[%c0_21, %c0_22], %40 {strides = array<i32>} : memref<32x64xbf16, #tpu.memory_space<vmem>>, vector<32x64xbf16>,
    %42 = vector.extract_strided_slice %32 {offsets = [0, 64], sizes = [32, 64], strides = [1, 1]} : vector<32x128xf32> to vector<32x64xf32>
    %43 = arith.truncf %42 : vector<32x64xf32> to vector<32x64xbf16>
    %c0_23 = arith.constant 0 : index
    %c0_24 = arith.constant 0 : index
    %44 = vector.load %arg10[%c0_23, %c0_24] : memref<32x64xbf16, #tpu.memory_space<vmem>>, vector<32x64xbf16>
    tpu.vector_store %arg10[%c0_23, %c0_24], %43 {strides = array<i32>} : memref<32x64xbf16, #tpu.memory_space<vmem>>, vector<32x64xbf16>,
    %45 = arith.truncf %38 : vector<32x64xf32> to vector<32x64xbf16>
    %c0_25 = arith.constant 0 : index
    %c0_26 = arith.constant 0 : index
    %46 = vector.load %arg11[%c0_25, %c0_26] : memref<32x64xbf16, #tpu.memory_space<vmem>>, vector<32x64xbf16>
    tpu.vector_store %arg11[%c0_25, %c0_26], %45 {strides = array<i32>} : memref<32x64xbf16, #tpu.memory_space<vmem>>, vector<32x64xbf16>,
    return
  }
  func.func @transform_0(%arg0: i32) -> (i32, i32) {
    %c0_i32 = arith.constant 0 : i32
    %c0_i32_0 = arith.constant 0 : i32
    return %arg0, %c0_i32 : i32, i32
  }
  func.func @transform_1(%arg0: i32) -> (i32, i32) {
    %c0_i32 = arith.constant 0 : i32
    %c0_i32_0 = arith.constant 0 : i32
    return %arg0, %c0_i32 : i32, i32
  }
  func.func @transform_2(%arg0: i32) -> (i32, i32) {
    %c0_i32 = arith.constant 0 : i32
    %c0_i32_0 = arith.constant 0 : i32
    %c0_i32_1 = arith.constant 0 : i32
    return %c0_i32, %c0_i32_0 : i32, i32
  }
  func.func @transform_3(%arg0: i32) -> (i32, i32) {
    %c0_i32 = arith.constant 0 : i32
    %c0_i32_0 = arith.constant 0 : i32
    %c0_i32_1 = arith.constant 0 : i32
    return %c0_i32, %c0_i32_0 : i32, i32
  }
  func.func @transform_4(%arg0: i32) -> (i32, i32) {
    %c0_i32 = arith.constant 0 : i32
    %c0_i32_0 = arith.constant 0 : i32
    %c0_i32_1 = arith.constant 0 : i32
    return %c0_i32, %c0_i32_0 : i32, i32
  }
  func.func @transform_5(%arg0: i32) -> (i32, i32) {
    %c0_i32 = arith.constant 0 : i32
    %c0_i32_0 = arith.constant 0 : i32
    %c0_i32_1 = arith.constant 0 : i32
    return %c0_i32, %c0_i32_0 : i32, i32
  }
  func.func @transform_6(%arg0: i32) -> (i32, i32) {
    %c0_i32 = arith.constant 0 : i32
    %c0_i32_0 = arith.constant 0 : i32
    %c0_i32_1 = arith.constant 0 : i32
    return %c0_i32, %c0_i32_0 : i32, i32
  }
  func.func @transform_7(%arg0: i32) -> (i32, i32) {
    %c0_i32 = arith.constant 0 : i32
    %c0_i32_0 = arith.constant 0 : i32
    %c0_i32_1 = arith.constant 0 : i32
    return %c0_i32, %c0_i32_0 : i32, i32
  }
  func.func @transform_8(%arg0: i32) -> (i32, i32) {
    %c0_i32 = arith.constant 0 : i32
    %c0_i32_0 = arith.constant 0 : i32
    return %arg0, %c0_i32 : i32, i32
  }
  func.func @transform_9(%arg0: i32) -> (i32, i32) {
    %c0_i32 = arith.constant 0 : i32
    %c0_i32_0 = arith.constant 0 : i32
    return %arg0, %c0_i32 : i32, i32
  }
  func.func @transform_10(%arg0: i32) -> (i32, i32) {
    %c0_i32 = arith.constant 0 : i32
    %c0_i32_0 = arith.constant 0 : i32
    return %arg0, %c0_i32 : i32, i32
  }
}

module attributes {stable_mosaic.version = 11 : i64} {
  func.func @_flash_attn_kernel(%arg0: i32, %arg1: i32, %arg2: i32, %arg3: memref<1x16x64xbf16, #tpu.memory_space<vmem>>, %arg4: memref<1x16x64xbf16, #tpu.memory_space<vmem>>, %arg5: memref<1x16x64xbf16, #tpu.memory_space<vmem>>, %arg6: memref<1x1x16xf32, #tpu.memory_space<vmem>>, %arg7: memref<1x16x64xbf16, #tpu.memory_space<vmem>>, %arg8: memref<16x4xf32, #tpu.memory_space<vmem>>, %arg9: memref<16x4xf32, #tpu.memory_space<vmem>>, %arg10: memref<16x64xf32, #tpu.memory_space<vmem>>) attributes {dimension_semantics = [#tpu.dimension_semantics<parallel>, #tpu.dimension_semantics<parallel>, #tpu.dimension_semantics<arbitrary>], iteration_bounds = array<i64: 1, 2, 1>, scalar_prefetch = 0 : i64, scratch_operands = 3 : i64, tpu.core_type = #tpu.core_type<tc>, window_params = [{transform_indices = @transform_0, window_bounds = array<i64: 1, 16, 64>}, {transform_indices = @transform_1, window_bounds = array<i64: 1, 16, 64>}, {transform_indices = @transform_2, window_bounds = array<i64: 1, 16, 64>}, {transform_indices = @transform_3, window_bounds = array<i64: 1, 1, 16>}, {transform_indices = @transform_4, window_bounds = array<i64: 1, 16, 64>}]} {
    %c0_i32 = arith.constant 0 : i32
    %0 = arith.cmpi eq, %arg2, %c0_i32 : i32
    %1 = arith.extui %0 : i1 to i32
    %c0_i32_0 = arith.constant 0 : i32
    %2 = arith.cmpi ne, %1, %c0_i32_0 : i32
    scf.if %2 {
      %cst_71 = arith.constant -1.000000e+30 : f32
      %130 = vector.broadcast %cst_71 : f32 to vector<16x4xf32>
      %c0_72 = arith.constant 0 : index
      %c0_73 = arith.constant 0 : index
      %131 = vector.load %arg8[%c0_72, %c0_73] : memref<16x4xf32, #tpu.memory_space<vmem>>, vector<16x4xf32>
      tpu.vector_store %arg8[%c0_72, %c0_73], %130 {strides = array<i32>} : memref<16x4xf32, #tpu.memory_space<vmem>>, vector<16x4xf32>,
      %cst_74 = arith.constant 0.000000e+00 : f32
      %132 = vector.broadcast %cst_74 : f32 to vector<16x4xf32>
      %c0_75 = arith.constant 0 : index
      %c0_76 = arith.constant 0 : index
      %133 = vector.load %arg9[%c0_75, %c0_76] : memref<16x4xf32, #tpu.memory_space<vmem>>, vector<16x4xf32>
      tpu.vector_store %arg9[%c0_75, %c0_76], %132 {strides = array<i32>} : memref<16x4xf32, #tpu.memory_space<vmem>>, vector<16x4xf32>,
      %cst_77 = arith.constant 0.000000e+00 : f32
      %134 = vector.broadcast %cst_77 : f32 to vector<16x64xf32>
      %c0_78 = arith.constant 0 : index
      %c0_79 = arith.constant 0 : index
      %135 = vector.load %arg10[%c0_78, %c0_79] : memref<16x64xf32, #tpu.memory_space<vmem>>, vector<16x64xf32>
      tpu.vector_store %arg10[%c0_78, %c0_79], %134 {strides = array<i32>} : memref<16x64xf32, #tpu.memory_space<vmem>>, vector<16x64xf32>,
    } else {
    }
    %c0 = arith.constant 0 : index
    %c0_1 = arith.constant 0 : index
    %c0_2 = arith.constant 0 : index
    %3 = vector.load %arg3[%c0, %c0_1, %c0_2] : memref<1x16x64xbf16, #tpu.memory_space<vmem>>, vector<1x16x64xbf16>
    %4 = vector.shape_cast %3 : vector<1x16x64xbf16> to vector<16x64xbf16>
    %c0_3 = arith.constant 0 : index
    %c0_4 = arith.constant 0 : index
    %c0_5 = arith.constant 0 : index
    %5 = vector.load %arg4[%c0_3, %c0_4, %c0_5] : memref<1x16x64xbf16, #tpu.memory_space<vmem>>, vector<1x16x64xbf16>
    %6 = vector.shape_cast %5 : vector<1x16x64xbf16> to vector<16x64xbf16>
    %c0_6 = arith.constant 0 : index
    %c0_7 = arith.constant 0 : index
    %c0_8 = arith.constant 0 : index
    %7 = vector.load %arg5[%c0_6, %c0_7, %c0_8] : memref<1x16x64xbf16, #tpu.memory_space<vmem>>, vector<1x16x64xbf16>
    %8 = vector.shape_cast %7 : vector<1x16x64xbf16> to vector<16x64xbf16>
    %c0_9 = arith.constant 0 : index
    %c0_10 = arith.constant 0 : index
    %c0_11 = arith.constant 0 : index
    %9 = vector.load %arg6[%c0_9, %c0_10, %c0_11] : memref<1x1x16xf32, #tpu.memory_space<vmem>>, vector<1x1x16xf32>
    %10 = vector.shape_cast %9 : vector<1x1x16xf32> to vector<1x16xf32>
    %11 = vector.extract_strided_slice %4 {offsets = [0, 0], sizes = [16, 16], strides = [1, 1]} : vector<16x64xbf16> to vector<16x16xbf16>
    %12 = vector.extract_strided_slice %6 {offsets = [0, 0], sizes = [16, 16], strides = [1, 1]} : vector<16x64xbf16> to vector<16x16xbf16>
    %cst = arith.constant dense<0.000000e+00> : vector<16x16xf32>
    %13 = tpu.matmul %11, %12, %cst {dimension_numbers = #tpu.dot_dimension_numbers<[1], [1], [0], [0], [0, 0, 1, 0], [], []>} : vector<16x16xbf16>, vector<16x16xbf16>, vector<16x16xf32> -> vector<16x16xf32>
    %14 = vector.broadcast %10 : vector<1x16xf32> to vector<16x16xf32>
    %15 = arith.addf %13, %14 : vector<16x16xf32>
    %c0_12 = arith.constant 0 : index
    %c0_13 = arith.constant 0 : index
    %16 = vector.load %arg8[%c0_12, %c0_13] : memref<16x4xf32, #tpu.memory_space<vmem>>, vector<16x1xf32>
    %cst_14 = arith.constant dense<0xFF800000> : vector<16xf32>
    %17 = vector.multi_reduction <maximumf>, %15, %cst_14 [1] : vector<16x16xf32> to vector<16xf32>
    %18 = vector.shape_cast %17 : vector<16xf32> to vector<16x1xf32>
    %19 = arith.maximumf %16, %18 : vector<16x1xf32>
    %20 = arith.subf %16, %19 : vector<16x1xf32>
    %21 = math.exp %20 : vector<16x1xf32>
    %22 = vector.broadcast %19 : vector<16x1xf32> to vector<16x16xf32>
    %23 = arith.subf %15, %22 : vector<16x16xf32>
    %24 = math.exp %23 : vector<16x16xf32>
    %c0_15 = arith.constant 0 : index
    %c0_16 = arith.constant 0 : index
    %25 = vector.load %arg9[%c0_15, %c0_16] : memref<16x4xf32, #tpu.memory_space<vmem>>, vector<16x1xf32>
    %26 = arith.mulf %21, %25 : vector<16x1xf32>
    %cst_17 = arith.constant dense<0.000000e+00> : vector<16xf32>
    %27 = vector.multi_reduction <add>, %24, %cst_17 [1] : vector<16x16xf32> to vector<16xf32>
    %28 = vector.shape_cast %27 : vector<16xf32> to vector<16x1xf32>
    %29 = arith.addf %26, %28 : vector<16x1xf32>
    %c0_18 = arith.constant 0 : index
    %c0_19 = arith.constant 0 : index
    %30 = vector.load %arg9[%c0_18, %c0_19] : memref<16x4xf32, #tpu.memory_space<vmem>>, vector<16x1xf32>
    tpu.vector_store %arg9[%c0_18, %c0_19], %29 {strides = array<i32>} : memref<16x4xf32, #tpu.memory_space<vmem>>, vector<16x1xf32>,
    %c0_20 = arith.constant 0 : index
    %c0_21 = arith.constant 0 : index
    %31 = vector.load %arg10[%c0_20, %c0_21] : memref<16x64xf32, #tpu.memory_space<vmem>>, vector<16x16xf32>
    %32 = vector.broadcast %21 : vector<16x1xf32> to vector<16x16xf32>
    %33 = arith.mulf %32, %31 : vector<16x16xf32>
    %34 = arith.truncf %24 : vector<16x16xf32> to vector<16x16xbf16>
    %35 = vector.extract_strided_slice %8 {offsets = [0, 0], sizes = [16, 16], strides = [1, 1]} : vector<16x64xbf16> to vector<16x16xbf16>
    %cst_22 = arith.constant dense<0.000000e+00> : vector<16x16xf32>
    %36 = tpu.matmul %34, %35, %cst_22 {dimension_numbers = #tpu.dot_dimension_numbers<[1], [0], [0], [1], [0, 0, 1, 1], [], []>} : vector<16x16xbf16>, vector<16x16xbf16>, vector<16x16xf32> -> vector<16x16xf32>
    %37 = arith.addf %33, %36 : vector<16x16xf32>
    %c0_23 = arith.constant 0 : index
    %c0_24 = arith.constant 0 : index
    %38 = vector.load %arg10[%c0_23, %c0_24] : memref<16x64xf32, #tpu.memory_space<vmem>>, vector<16x16xf32>
    tpu.vector_store %arg10[%c0_23, %c0_24], %37 {strides = array<i32>} : memref<16x64xf32, #tpu.memory_space<vmem>>, vector<16x16xf32>,
    %c0_25 = arith.constant 0 : index
    %c0_26 = arith.constant 0 : index
    %39 = vector.load %arg8[%c0_25, %c0_26] : memref<16x4xf32, #tpu.memory_space<vmem>>, vector<16x1xf32>
    tpu.vector_store %arg8[%c0_25, %c0_26], %19 {strides = array<i32>} : memref<16x4xf32, #tpu.memory_space<vmem>>, vector<16x1xf32>,
    %40 = vector.extract_strided_slice %4 {offsets = [0, 16], sizes = [16, 16], strides = [1, 1]} : vector<16x64xbf16> to vector<16x16xbf16>
    %41 = vector.extract_strided_slice %6 {offsets = [0, 16], sizes = [16, 16], strides = [1, 1]} : vector<16x64xbf16> to vector<16x16xbf16>
    %cst_27 = arith.constant dense<0.000000e+00> : vector<16x16xf32>
    %42 = tpu.matmul %40, %41, %cst_27 {dimension_numbers = #tpu.dot_dimension_numbers<[1], [1], [0], [0], [0, 0, 1, 0], [], []>} : vector<16x16xbf16>, vector<16x16xbf16>, vector<16x16xf32> -> vector<16x16xf32>
    %43 = vector.broadcast %10 : vector<1x16xf32> to vector<16x16xf32>
    %44 = arith.addf %42, %43 : vector<16x16xf32>
    %c0_28 = arith.constant 0 : index
    %c1 = arith.constant 1 : index
    %45 = vector.load %arg8[%c0_28, %c1] : memref<16x4xf32, #tpu.memory_space<vmem>>, vector<16x1xf32>
    %cst_29 = arith.constant dense<0xFF800000> : vector<16xf32>
    %46 = vector.multi_reduction <maximumf>, %44, %cst_29 [1] : vector<16x16xf32> to vector<16xf32>
    %47 = vector.shape_cast %46 : vector<16xf32> to vector<16x1xf32>
    %48 = arith.maximumf %45, %47 : vector<16x1xf32>
    %49 = arith.subf %45, %48 : vector<16x1xf32>
    %50 = math.exp %49 : vector<16x1xf32>
    %51 = vector.broadcast %48 : vector<16x1xf32> to vector<16x16xf32>
    %52 = arith.subf %44, %51 : vector<16x16xf32>
    %53 = math.exp %52 : vector<16x16xf32>
    %c0_30 = arith.constant 0 : index
    %c1_31 = arith.constant 1 : index
    %54 = vector.load %arg9[%c0_30, %c1_31] : memref<16x4xf32, #tpu.memory_space<vmem>>, vector<16x1xf32>
    %55 = arith.mulf %50, %54 : vector<16x1xf32>
    %cst_32 = arith.constant dense<0.000000e+00> : vector<16xf32>
    %56 = vector.multi_reduction <add>, %53, %cst_32 [1] : vector<16x16xf32> to vector<16xf32>
    %57 = vector.shape_cast %56 : vector<16xf32> to vector<16x1xf32>
    %58 = arith.addf %55, %57 : vector<16x1xf32>
    %c0_33 = arith.constant 0 : index
    %c1_34 = arith.constant 1 : index
    %59 = vector.load %arg9[%c0_33, %c1_34] : memref<16x4xf32, #tpu.memory_space<vmem>>, vector<16x1xf32>
    tpu.vector_store %arg9[%c0_33, %c1_34], %58 {strides = array<i32>} : memref<16x4xf32, #tpu.memory_space<vmem>>, vector<16x1xf32>,
    %c0_35 = arith.constant 0 : index
    %c16 = arith.constant 16 : index
    %60 = vector.load %arg10[%c0_35, %c16] : memref<16x64xf32, #tpu.memory_space<vmem>>, vector<16x16xf32>
    %61 = vector.broadcast %50 : vector<16x1xf32> to vector<16x16xf32>
    %62 = arith.mulf %61, %60 : vector<16x16xf32>
    %63 = arith.truncf %53 : vector<16x16xf32> to vector<16x16xbf16>
    %64 = vector.extract_strided_slice %8 {offsets = [0, 16], sizes = [16, 16], strides = [1, 1]} : vector<16x64xbf16> to vector<16x16xbf16>
    %cst_36 = arith.constant dense<0.000000e+00> : vector<16x16xf32>
    %65 = tpu.matmul %63, %64, %cst_36 {dimension_numbers = #tpu.dot_dimension_numbers<[1], [0], [0], [1], [0, 0, 1, 1], [], []>} : vector<16x16xbf16>, vector<16x16xbf16>, vector<16x16xf32> -> vector<16x16xf32>
    %66 = arith.addf %62, %65 : vector<16x16xf32>
    %c0_37 = arith.constant 0 : index
    %c16_38 = arith.constant 16 : index
    %67 = vector.load %arg10[%c0_37, %c16_38] : memref<16x64xf32, #tpu.memory_space<vmem>>, vector<16x16xf32>
    tpu.vector_store %arg10[%c0_37, %c16_38], %66 {strides = array<i32>} : memref<16x64xf32, #tpu.memory_space<vmem>>, vector<16x16xf32>,
    %c0_39 = arith.constant 0 : index
    %c1_40 = arith.constant 1 : index
    %68 = vector.load %arg8[%c0_39, %c1_40] : memref<16x4xf32, #tpu.memory_space<vmem>>, vector<16x1xf32>
    tpu.vector_store %arg8[%c0_39, %c1_40], %48 {strides = array<i32>} : memref<16x4xf32, #tpu.memory_space<vmem>>, vector<16x1xf32>,
    %69 = vector.extract_strided_slice %4 {offsets = [0, 32], sizes = [16, 16], strides = [1, 1]} : vector<16x64xbf16> to vector<16x16xbf16>
    %70 = vector.extract_strided_slice %6 {offsets = [0, 32], sizes = [16, 16], strides = [1, 1]} : vector<16x64xbf16> to vector<16x16xbf16>
    %cst_41 = arith.constant dense<0.000000e+00> : vector<16x16xf32>
    %71 = tpu.matmul %69, %70, %cst_41 {dimension_numbers = #tpu.dot_dimension_numbers<[1], [1], [0], [0], [0, 0, 1, 0], [], []>} : vector<16x16xbf16>, vector<16x16xbf16>, vector<16x16xf32> -> vector<16x16xf32>
    %72 = vector.broadcast %10 : vector<1x16xf32> to vector<16x16xf32>
    %73 = arith.addf %71, %72 : vector<16x16xf32>
    %c0_42 = arith.constant 0 : index
    %c2 = arith.constant 2 : index
    %74 = vector.load %arg8[%c0_42, %c2] : memref<16x4xf32, #tpu.memory_space<vmem>>, vector<16x1xf32>
    %cst_43 = arith.constant dense<0xFF800000> : vector<16xf32>
    %75 = vector.multi_reduction <maximumf>, %73, %cst_43 [1] : vector<16x16xf32> to vector<16xf32>
    %76 = vector.shape_cast %75 : vector<16xf32> to vector<16x1xf32>
    %77 = arith.maximumf %74, %76 : vector<16x1xf32>
    %78 = arith.subf %74, %77 : vector<16x1xf32>
    %79 = math.exp %78 : vector<16x1xf32>
    %80 = vector.broadcast %77 : vector<16x1xf32> to vector<16x16xf32>
    %81 = arith.subf %73, %80 : vector<16x16xf32>
    %82 = math.exp %81 : vector<16x16xf32>
    %c0_44 = arith.constant 0 : index
    %c2_45 = arith.constant 2 : index
    %83 = vector.load %arg9[%c0_44, %c2_45] : memref<16x4xf32, #tpu.memory_space<vmem>>, vector<16x1xf32>
    %84 = arith.mulf %79, %83 : vector<16x1xf32>
    %cst_46 = arith.constant dense<0.000000e+00> : vector<16xf32>
    %85 = vector.multi_reduction <add>, %82, %cst_46 [1] : vector<16x16xf32> to vector<16xf32>
    %86 = vector.shape_cast %85 : vector<16xf32> to vector<16x1xf32>
    %87 = arith.addf %84, %86 : vector<16x1xf32>
    %c0_47 = arith.constant 0 : index
    %c2_48 = arith.constant 2 : index
    %88 = vector.load %arg9[%c0_47, %c2_48] : memref<16x4xf32, #tpu.memory_space<vmem>>, vector<16x1xf32>
    tpu.vector_store %arg9[%c0_47, %c2_48], %87 {strides = array<i32>} : memref<16x4xf32, #tpu.memory_space<vmem>>, vector<16x1xf32>,
    %c0_49 = arith.constant 0 : index
    %c32 = arith.constant 32 : index
    %89 = vector.load %arg10[%c0_49, %c32] : memref<16x64xf32, #tpu.memory_space<vmem>>, vector<16x16xf32>
    %90 = vector.broadcast %79 : vector<16x1xf32> to vector<16x16xf32>
    %91 = arith.mulf %90, %89 : vector<16x16xf32>
    %92 = arith.truncf %82 : vector<16x16xf32> to vector<16x16xbf16>
    %93 = vector.extract_strided_slice %8 {offsets = [0, 32], sizes = [16, 16], strides = [1, 1]} : vector<16x64xbf16> to vector<16x16xbf16>
    %cst_50 = arith.constant dense<0.000000e+00> : vector<16x16xf32>
    %94 = tpu.matmul %92, %93, %cst_50 {dimension_numbers = #tpu.dot_dimension_numbers<[1], [0], [0], [1], [0, 0, 1, 1], [], []>} : vector<16x16xbf16>, vector<16x16xbf16>, vector<16x16xf32> -> vector<16x16xf32>
    %95 = arith.addf %91, %94 : vector<16x16xf32>
    %c0_51 = arith.constant 0 : index
    %c32_52 = arith.constant 32 : index
    %96 = vector.load %arg10[%c0_51, %c32_52] : memref<16x64xf32, #tpu.memory_space<vmem>>, vector<16x16xf32>
    tpu.vector_store %arg10[%c0_51, %c32_52], %95 {strides = array<i32>} : memref<16x64xf32, #tpu.memory_space<vmem>>, vector<16x16xf32>,
    %c0_53 = arith.constant 0 : index
    %c2_54 = arith.constant 2 : index
    %97 = vector.load %arg8[%c0_53, %c2_54] : memref<16x4xf32, #tpu.memory_space<vmem>>, vector<16x1xf32>
    tpu.vector_store %arg8[%c0_53, %c2_54], %77 {strides = array<i32>} : memref<16x4xf32, #tpu.memory_space<vmem>>, vector<16x1xf32>,
    %98 = vector.extract_strided_slice %4 {offsets = [0, 48], sizes = [16, 16], strides = [1, 1]} : vector<16x64xbf16> to vector<16x16xbf16>
    %99 = vector.extract_strided_slice %6 {offsets = [0, 48], sizes = [16, 16], strides = [1, 1]} : vector<16x64xbf16> to vector<16x16xbf16>
    %cst_55 = arith.constant dense<0.000000e+00> : vector<16x16xf32>
    %100 = tpu.matmul %98, %99, %cst_55 {dimension_numbers = #tpu.dot_dimension_numbers<[1], [1], [0], [0], [0, 0, 1, 0], [], []>} : vector<16x16xbf16>, vector<16x16xbf16>, vector<16x16xf32> -> vector<16x16xf32>
    %101 = vector.broadcast %10 : vector<1x16xf32> to vector<16x16xf32>
    %102 = arith.addf %100, %101 : vector<16x16xf32>
    %c0_56 = arith.constant 0 : index
    %c3 = arith.constant 3 : index
    %103 = vector.load %arg8[%c0_56, %c3] : memref<16x4xf32, #tpu.memory_space<vmem>>, vector<16x1xf32>
    %cst_57 = arith.constant dense<0xFF800000> : vector<16xf32>
    %104 = vector.multi_reduction <maximumf>, %102, %cst_57 [1] : vector<16x16xf32> to vector<16xf32>
    %105 = vector.shape_cast %104 : vector<16xf32> to vector<16x1xf32>
    %106 = arith.maximumf %103, %105 : vector<16x1xf32>
    %107 = arith.subf %103, %106 : vector<16x1xf32>
    %108 = math.exp %107 : vector<16x1xf32>
    %109 = vector.broadcast %106 : vector<16x1xf32> to vector<16x16xf32>
    %110 = arith.subf %102, %109 : vector<16x16xf32>
    %111 = math.exp %110 : vector<16x16xf32>
    %c0_58 = arith.constant 0 : index
    %c3_59 = arith.constant 3 : index
    %112 = vector.load %arg9[%c0_58, %c3_59] : memref<16x4xf32, #tpu.memory_space<vmem>>, vector<16x1xf32>
    %113 = arith.mulf %108, %112 : vector<16x1xf32>
    %cst_60 = arith.constant dense<0.000000e+00> : vector<16xf32>
    %114 = vector.multi_reduction <add>, %111, %cst_60 [1] : vector<16x16xf32> to vector<16xf32>
    %115 = vector.shape_cast %114 : vector<16xf32> to vector<16x1xf32>
    %116 = arith.addf %113, %115 : vector<16x1xf32>
    %c0_61 = arith.constant 0 : index
    %c3_62 = arith.constant 3 : index
    %117 = vector.load %arg9[%c0_61, %c3_62] : memref<16x4xf32, #tpu.memory_space<vmem>>, vector<16x1xf32>
    tpu.vector_store %arg9[%c0_61, %c3_62], %116 {strides = array<i32>} : memref<16x4xf32, #tpu.memory_space<vmem>>, vector<16x1xf32>,
    %c0_63 = arith.constant 0 : index
    %c48 = arith.constant 48 : index
    %118 = vector.load %arg10[%c0_63, %c48] : memref<16x64xf32, #tpu.memory_space<vmem>>, vector<16x16xf32>
    %119 = vector.broadcast %108 : vector<16x1xf32> to vector<16x16xf32>
    %120 = arith.mulf %119, %118 : vector<16x16xf32>
    %121 = arith.truncf %111 : vector<16x16xf32> to vector<16x16xbf16>
    %122 = vector.extract_strided_slice %8 {offsets = [0, 48], sizes = [16, 16], strides = [1, 1]} : vector<16x64xbf16> to vector<16x16xbf16>
    %cst_64 = arith.constant dense<0.000000e+00> : vector<16x16xf32>
    %123 = tpu.matmul %121, %122, %cst_64 {dimension_numbers = #tpu.dot_dimension_numbers<[1], [0], [0], [1], [0, 0, 1, 1], [], []>} : vector<16x16xbf16>, vector<16x16xbf16>, vector<16x16xf32> -> vector<16x16xf32>
    %124 = arith.addf %120, %123 : vector<16x16xf32>
    %c0_65 = arith.constant 0 : index
    %c48_66 = arith.constant 48 : index
    %125 = vector.load %arg10[%c0_65, %c48_66] : memref<16x64xf32, #tpu.memory_space<vmem>>, vector<16x16xf32>
    tpu.vector_store %arg10[%c0_65, %c48_66], %124 {strides = array<i32>} : memref<16x64xf32, #tpu.memory_space<vmem>>, vector<16x16xf32>,
    %c0_67 = arith.constant 0 : index
    %c3_68 = arith.constant 3 : index
    %126 = vector.load %arg8[%c0_67, %c3_68] : memref<16x4xf32, #tpu.memory_space<vmem>>, vector<16x1xf32>
    tpu.vector_store %arg8[%c0_67, %c3_68], %106 {strides = array<i32>} : memref<16x4xf32, #tpu.memory_space<vmem>>, vector<16x1xf32>,
    %c0_i32_69 = arith.constant 0 : i32
    %127 = arith.cmpi eq, %arg2, %c0_i32_69 : i32
    %128 = arith.extui %127 : i1 to i32
    %c0_i32_70 = arith.constant 0 : i32
    %129 = arith.cmpi ne, %128, %c0_i32_70 : i32
    scf.if %129 {
      %c0_71 = arith.constant 0 : index
      %c0_72 = arith.constant 0 : index
      %130 = vector.load %arg9[%c0_71, %c0_72] : memref<16x4xf32, #tpu.memory_space<vmem>>, vector<16x1xf32>
      %131 = tpu.reciprocal %130 : vector<16x1xf32> -> vector<16x1xf32>
      %c0_73 = arith.constant 0 : index
      %c0_74 = arith.constant 0 : index
      %132 = vector.load %arg10[%c0_73, %c0_74] : memref<16x64xf32, #tpu.memory_space<vmem>>, vector<16x16xf32>
      %133 = vector.broadcast %131 : vector<16x1xf32> to vector<16x16xf32>
      %134 = arith.mulf %132, %133 : vector<16x16xf32>
      %135 = arith.truncf %134 : vector<16x16xf32> to vector<16x16xbf16>
      %c0_75 = arith.constant 0 : index
      %c0_76 = arith.constant 0 : index
      %c0_77 = arith.constant 0 : index
      %136 = vector.load %arg7[%c0_75, %c0_76, %c0_77] : memref<1x16x64xbf16, #tpu.memory_space<vmem>>, vector<1x16x16xbf16>
      %137 = vector.shape_cast %136 : vector<1x16x16xbf16> to vector<16x16xbf16>
      %138 = vector.shape_cast %135 : vector<16x16xbf16> to vector<1x16x16xbf16>
      tpu.vector_store %arg7[%c0_75, %c0_76, %c0_77], %138 {strides = array<i32>} : memref<1x16x64xbf16, #tpu.memory_space<vmem>>, vector<1x16x16xbf16>,
      %c0_78 = arith.constant 0 : index
      %c1_79 = arith.constant 1 : index
      %139 = vector.load %arg9[%c0_78, %c1_79] : memref<16x4xf32, #tpu.memory_space<vmem>>, vector<16x1xf32>
      %140 = tpu.reciprocal %139 : vector<16x1xf32> -> vector<16x1xf32>
      %c0_80 = arith.constant 0 : index
      %c16_81 = arith.constant 16 : index
      %141 = vector.load %arg10[%c0_80, %c16_81] : memref<16x64xf32, #tpu.memory_space<vmem>>, vector<16x16xf32>
      %142 = vector.broadcast %140 : vector<16x1xf32> to vector<16x16xf32>
      %143 = arith.mulf %141, %142 : vector<16x16xf32>
      %144 = arith.truncf %143 : vector<16x16xf32> to vector<16x16xbf16>
      %c0_82 = arith.constant 0 : index
      %c0_83 = arith.constant 0 : index
      %c16_84 = arith.constant 16 : index
      %145 = vector.load %arg7[%c0_82, %c0_83, %c16_84] : memref<1x16x64xbf16, #tpu.memory_space<vmem>>, vector<1x16x16xbf16>
      %146 = vector.shape_cast %145 : vector<1x16x16xbf16> to vector<16x16xbf16>
      %147 = vector.shape_cast %144 : vector<16x16xbf16> to vector<1x16x16xbf16>
      tpu.vector_store %arg7[%c0_82, %c0_83, %c16_84], %147 {strides = array<i32>} : memref<1x16x64xbf16, #tpu.memory_space<vmem>>, vector<1x16x16xbf16>,
      %c0_85 = arith.constant 0 : index
      %c2_86 = arith.constant 2 : index
      %148 = vector.load %arg9[%c0_85, %c2_86] : memref<16x4xf32, #tpu.memory_space<vmem>>, vector<16x1xf32>
      %149 = tpu.reciprocal %148 : vector<16x1xf32> -> vector<16x1xf32>
      %c0_87 = arith.constant 0 : index
      %c32_88 = arith.constant 32 : index
      %150 = vector.load %arg10[%c0_87, %c32_88] : memref<16x64xf32, #tpu.memory_space<vmem>>, vector<16x16xf32>
      %151 = vector.broadcast %149 : vector<16x1xf32> to vector<16x16xf32>
      %152 = arith.mulf %150, %151 : vector<16x16xf32>
      %153 = arith.truncf %152 : vector<16x16xf32> to vector<16x16xbf16>
      %c0_89 = arith.constant 0 : index
      %c0_90 = arith.constant 0 : index
      %c32_91 = arith.constant 32 : index
      %154 = vector.load %arg7[%c0_89, %c0_90, %c32_91] : memref<1x16x64xbf16, #tpu.memory_space<vmem>>, vector<1x16x16xbf16>
      %155 = vector.shape_cast %154 : vector<1x16x16xbf16> to vector<16x16xbf16>
      %156 = vector.shape_cast %153 : vector<16x16xbf16> to vector<1x16x16xbf16>
      tpu.vector_store %arg7[%c0_89, %c0_90, %c32_91], %156 {strides = array<i32>} : memref<1x16x64xbf16, #tpu.memory_space<vmem>>, vector<1x16x16xbf16>,
      %c0_92 = arith.constant 0 : index
      %c3_93 = arith.constant 3 : index
      %157 = vector.load %arg9[%c0_92, %c3_93] : memref<16x4xf32, #tpu.memory_space<vmem>>, vector<16x1xf32>
      %158 = tpu.reciprocal %157 : vector<16x1xf32> -> vector<16x1xf32>
      %c0_94 = arith.constant 0 : index
      %c48_95 = arith.constant 48 : index
      %159 = vector.load %arg10[%c0_94, %c48_95] : memref<16x64xf32, #tpu.memory_space<vmem>>, vector<16x16xf32>
      %160 = vector.broadcast %158 : vector<16x1xf32> to vector<16x16xf32>
      %161 = arith.mulf %159, %160 : vector<16x16xf32>
      %162 = arith.truncf %161 : vector<16x16xf32> to vector<16x16xbf16>
      %c0_96 = arith.constant 0 : index
      %c0_97 = arith.constant 0 : index
      %c48_98 = arith.constant 48 : index
      %163 = vector.load %arg7[%c0_96, %c0_97, %c48_98] : memref<1x16x64xbf16, #tpu.memory_space<vmem>>, vector<1x16x16xbf16>
      %164 = vector.shape_cast %163 : vector<1x16x16xbf16> to vector<16x16xbf16>
      %165 = vector.shape_cast %162 : vector<16x16xbf16> to vector<1x16x16xbf16>
      tpu.vector_store %arg7[%c0_96, %c0_97, %c48_98], %165 {strides = array<i32>} : memref<1x16x64xbf16, #tpu.memory_space<vmem>>, vector<1x16x16xbf16>,
    } else {
    }
    return
  }
  func.func @transform_0(%arg0: i32, %arg1: i32, %arg2: i32) -> (i32, i32, i32) {
    %c0_i32 = arith.constant 0 : i32
    %c0_i32_0 = arith.constant 0 : i32
    return %arg1, %arg0, %c0_i32 : i32, i32, i32
  }
  func.func @transform_1(%arg0: i32, %arg1: i32, %arg2: i32) -> (i32, i32, i32) {
    %c0_i32 = arith.constant 0 : i32
    %c0_i32_0 = arith.constant 0 : i32
    return %arg1, %arg2, %c0_i32 : i32, i32, i32
  }
  func.func @transform_2(%arg0: i32, %arg1: i32, %arg2: i32) -> (i32, i32, i32) {
    %c0_i32 = arith.constant 0 : i32
    %c0_i32_0 = arith.constant 0 : i32
    return %arg1, %arg2, %c0_i32 : i32, i32, i32
  }
  func.func @transform_3(%arg0: i32, %arg1: i32, %arg2: i32) -> (i32, i32, i32) {
    %c0_i32 = arith.constant 0 : i32
    %c0_i32_0 = arith.constant 0 : i32
    return %arg1, %c0_i32, %arg2 : i32, i32, i32
  }
  func.func @transform_4(%arg0: i32, %arg1: i32, %arg2: i32) -> (i32, i32, i32) {
    %c0_i32 = arith.constant 0 : i32
    %c0_i32_0 = arith.constant 0 : i32
    return %arg1, %arg0, %c0_i32 : i32, i32, i32
  }
}

module attributes {stable_mosaic.version = 11 : i64} {
  func.func @_ln_linear_relu_kernel(%arg0: i32, %arg1: memref<32x64xf32, #tpu.memory_space<vmem>>, %arg2: memref<1x64xf32, #tpu.memory_space<vmem>>, %arg3: memref<1x64xf32, #tpu.memory_space<vmem>>, %arg4: memref<64x256xbf16, #tpu.memory_space<vmem>>, %arg5: memref<1x256xf32, #tpu.memory_space<vmem>>, %arg6: memref<32x256xbf16, #tpu.memory_space<vmem>>) attributes {dimension_semantics = [#tpu.dimension_semantics<parallel>], iteration_bounds = array<i64: 1>, scalar_prefetch = 0 : i64, scratch_operands = 0 : i64, tpu.core_type = #tpu.core_type<tc>, window_params = [{transform_indices = @transform_0, window_bounds = array<i64: 32, 64>}, {pipeline_mode = #tpu.pipeline_mode<synchronous>, transform_indices = @transform_1, window_bounds = array<i64: 1, 64>}, {pipeline_mode = #tpu.pipeline_mode<synchronous>, transform_indices = @transform_2, window_bounds = array<i64: 1, 64>}, {pipeline_mode = #tpu.pipeline_mode<synchronous>, transform_indices = @transform_3, window_bounds = array<i64: 64, 256>}, {pipeline_mode = #tpu.pipeline_mode<synchronous>, transform_indices = @transform_4, window_bounds = array<i64: 1, 256>}, {transform_indices = @transform_5, window_bounds = array<i64: 32, 256>}]} {
    %c0 = arith.constant 0 : index
    %c0_0 = arith.constant 0 : index
    %0 = vector.load %arg1[%c0, %c0_0] : memref<32x64xf32, #tpu.memory_space<vmem>>, vector<32x64xf32>
    %c0_1 = arith.constant 0 : index
    %c0_2 = arith.constant 0 : index
    %1 = vector.load %arg2[%c0_1, %c0_2] : memref<1x64xf32, #tpu.memory_space<vmem>>, vector<1x64xf32>
    %c0_3 = arith.constant 0 : index
    %c0_4 = arith.constant 0 : index
    %2 = vector.load %arg3[%c0_3, %c0_4] : memref<1x64xf32, #tpu.memory_space<vmem>>, vector<1x64xf32>
    %cst = arith.constant dense<0.000000e+00> : vector<32xf32>
    %3 = vector.multi_reduction <add>, %0, %cst [1] : vector<32x64xf32> to vector<32xf32>
    %4 = vector.shape_cast %3 : vector<32xf32> to vector<32x1xf32>
    %cst_5 = arith.constant 6.400000e+01 : f32
    %5 = vector.broadcast %cst_5 : f32 to vector<32x1xf32>
    %6 = arith.divf %4, %5 : vector<32x1xf32>
    %7 = vector.broadcast %6 : vector<32x1xf32> to vector<32x64xf32>
    %8 = arith.subf %0, %7 : vector<32x64xf32>
    %9 = arith.mulf %8, %8 : vector<32x64xf32>
    %cst_6 = arith.constant dense<0.000000e+00> : vector<32xf32>
    %10 = vector.multi_reduction <add>, %9, %cst_6 [1] : vector<32x64xf32> to vector<32xf32>
    %11 = vector.shape_cast %10 : vector<32xf32> to vector<32x1xf32>
    %cst_7 = arith.constant 6.400000e+01 : f32
    %12 = vector.broadcast %cst_7 : f32 to vector<32x1xf32>
    %13 = arith.divf %11, %12 : vector<32x1xf32>
    %14 = vector.broadcast %6 : vector<32x1xf32> to vector<32x64xf32>
    %15 = arith.subf %0, %14 : vector<32x64xf32>
    %cst_8 = arith.constant 9.99999974E-6 : f32
    %16 = vector.broadcast %cst_8 : f32 to vector<32x1xf32>
    %17 = arith.addf %13, %16 : vector<32x1xf32>
    %18 = math.rsqrt %17 : vector<32x1xf32>
    %19 = vector.broadcast %18 : vector<32x1xf32> to vector<32x64xf32>
    %20 = arith.mulf %15, %19 : vector<32x64xf32>
    %21 = vector.broadcast %1 : vector<1x64xf32> to vector<32x64xf32>
    %22 = arith.mulf %20, %21 : vector<32x64xf32>
    %23 = vector.broadcast %2 : vector<1x64xf32> to vector<32x64xf32>
    %24 = arith.addf %22, %23 : vector<32x64xf32>
    %25 = arith.truncf %24 : vector<32x64xf32> to vector<32x64xbf16>
    %c0_9 = arith.constant 0 : index
    %c0_10 = arith.constant 0 : index
    %26 = vector.load %arg4[%c0_9, %c0_10] : memref<64x256xbf16, #tpu.memory_space<vmem>>, vector<64x256xbf16>
    %cst_11 = arith.constant dense<0.000000e+00> : vector<32x256xf32>
    %27 = tpu.matmul %25, %26, %cst_11 {dimension_numbers = #tpu.dot_dimension_numbers<[1], [0], [0], [1], [0, 0, 1, 1], [], []>} : vector<32x64xbf16>, vector<64x256xbf16>, vector<32x256xf32> -> vector<32x256xf32>
    %c0_12 = arith.constant 0 : index
    %c0_13 = arith.constant 0 : index
    %28 = vector.load %arg5[%c0_12, %c0_13] : memref<1x256xf32, #tpu.memory_space<vmem>>, vector<1x256xf32>
    %29 = vector.broadcast %28 : vector<1x256xf32> to vector<32x256xf32>
    %30 = arith.addf %27, %29 : vector<32x256xf32>
    %cst_14 = arith.constant 0.000000e+00 : f32
    %31 = vector.broadcast %cst_14 : f32 to vector<32x256xf32>
    %32 = arith.maximumf %30, %31 : vector<32x256xf32>
    %33 = arith.truncf %32 : vector<32x256xf32> to vector<32x256xbf16>
    %c0_15 = arith.constant 0 : index
    %c0_16 = arith.constant 0 : index
    %34 = vector.load %arg6[%c0_15, %c0_16] : memref<32x256xbf16, #tpu.memory_space<vmem>>, vector<32x256xbf16>
    tpu.vector_store %arg6[%c0_15, %c0_16], %33 {strides = array<i32>} : memref<32x256xbf16, #tpu.memory_space<vmem>>, vector<32x256xbf16>,
    return
  }
  func.func @transform_0(%arg0: i32) -> (i32, i32) {
    %c0_i32 = arith.constant 0 : i32
    %c0_i32_0 = arith.constant 0 : i32
    return %arg0, %c0_i32 : i32, i32
  }
  func.func @transform_1(%arg0: i32) -> (i32, i32) {
    %c0_i32 = arith.constant 0 : i32
    %c0_i32_0 = arith.constant 0 : i32
    %c0_i32_1 = arith.constant 0 : i32
    return %c0_i32, %c0_i32_0 : i32, i32
  }
  func.func @transform_2(%arg0: i32) -> (i32, i32) {
    %c0_i32 = arith.constant 0 : i32
    %c0_i32_0 = arith.constant 0 : i32
    %c0_i32_1 = arith.constant 0 : i32
    return %c0_i32, %c0_i32_0 : i32, i32
  }
  func.func @transform_3(%arg0: i32) -> (i32, i32) {
    %c0_i32 = arith.constant 0 : i32
    %c0_i32_0 = arith.constant 0 : i32
    %c0_i32_1 = arith.constant 0 : i32
    return %c0_i32, %c0_i32_0 : i32, i32
  }
  func.func @transform_4(%arg0: i32) -> (i32, i32) {
    %c0_i32 = arith.constant 0 : i32
    %c0_i32_0 = arith.constant 0 : i32
    %c0_i32_1 = arith.constant 0 : i32
    return %c0_i32, %c0_i32_0 : i32, i32
  }
  func.func @transform_5(%arg0: i32) -> (i32, i32) {
    %c0_i32 = arith.constant 0 : i32
    %c0_i32_0 = arith.constant 0 : i32
    return %arg0, %c0_i32 : i32, i32
  }
}

module attributes {stable_mosaic.version = 11 : i64} {
  func.func @_linear_residual_kernel(%arg0: i32, %arg1: memref<32x64xbf16, #tpu.memory_space<vmem>>, %arg2: memref<64x64xbf16, #tpu.memory_space<vmem>>, %arg3: memref<1x64xf32, #tpu.memory_space<vmem>>, %arg4: memref<32x64xf32, #tpu.memory_space<vmem>>, %arg5: memref<32x64xf32, #tpu.memory_space<vmem>>) attributes {dimension_semantics = [#tpu.dimension_semantics<parallel>], iteration_bounds = array<i64: 1>, scalar_prefetch = 0 : i64, scratch_operands = 0 : i64, tpu.core_type = #tpu.core_type<tc>, window_params = [{transform_indices = @transform_0, window_bounds = array<i64: 32, 64>}, {pipeline_mode = #tpu.pipeline_mode<synchronous>, transform_indices = @transform_1, window_bounds = array<i64: 64, 64>}, {pipeline_mode = #tpu.pipeline_mode<synchronous>, transform_indices = @transform_2, window_bounds = array<i64: 1, 64>}, {transform_indices = @transform_3, window_bounds = array<i64: 32, 64>}, {transform_indices = @transform_4, window_bounds = array<i64: 32, 64>}]} {
    %c0 = arith.constant 0 : index
    %c0_0 = arith.constant 0 : index
    %0 = vector.load %arg1[%c0, %c0_0] : memref<32x64xbf16, #tpu.memory_space<vmem>>, vector<32x64xbf16>
    %c0_1 = arith.constant 0 : index
    %c0_2 = arith.constant 0 : index
    %1 = vector.load %arg2[%c0_1, %c0_2] : memref<64x64xbf16, #tpu.memory_space<vmem>>, vector<64x64xbf16>
    %cst = arith.constant dense<0.000000e+00> : vector<32x64xf32>
    %2 = tpu.matmul %0, %1, %cst {dimension_numbers = #tpu.dot_dimension_numbers<[1], [0], [0], [1], [0, 0, 1, 1], [], []>} : vector<32x64xbf16>, vector<64x64xbf16>, vector<32x64xf32> -> vector<32x64xf32>
    %c0_3 = arith.constant 0 : index
    %c0_4 = arith.constant 0 : index
    %3 = vector.load %arg3[%c0_3, %c0_4] : memref<1x64xf32, #tpu.memory_space<vmem>>, vector<1x64xf32>
    %4 = vector.broadcast %3 : vector<1x64xf32> to vector<32x64xf32>
    %5 = arith.addf %2, %4 : vector<32x64xf32>
    %c0_5 = arith.constant 0 : index
    %c0_6 = arith.constant 0 : index
    %6 = vector.load %arg4[%c0_5, %c0_6] : memref<32x64xf32, #tpu.memory_space<vmem>>, vector<32x64xf32>
    %7 = arith.addf %5, %6 : vector<32x64xf32>
    %c0_7 = arith.constant 0 : index
    %c0_8 = arith.constant 0 : index
    %8 = vector.load %arg5[%c0_7, %c0_8] : memref<32x64xf32, #tpu.memory_space<vmem>>, vector<32x64xf32>
    tpu.vector_store %arg5[%c0_7, %c0_8], %7 {strides = array<i32>} : memref<32x64xf32, #tpu.memory_space<vmem>>, vector<32x64xf32>,
    return
  }
  func.func @transform_0(%arg0: i32) -> (i32, i32) {
    %c0_i32 = arith.constant 0 : i32
    %c0_i32_0 = arith.constant 0 : i32
    return %arg0, %c0_i32 : i32, i32
  }
  func.func @transform_1(%arg0: i32) -> (i32, i32) {
    %c0_i32 = arith.constant 0 : i32
    %c0_i32_0 = arith.constant 0 : i32
    %c0_i32_1 = arith.constant 0 : i32
    return %c0_i32, %c0_i32_0 : i32, i32
  }
  func.func @transform_2(%arg0: i32) -> (i32, i32) {
    %c0_i32 = arith.constant 0 : i32
    %c0_i32_0 = arith.constant 0 : i32
    %c0_i32_1 = arith.constant 0 : i32
    return %c0_i32, %c0_i32_0 : i32, i32
  }
  func.func @transform_3(%arg0: i32) -> (i32, i32) {
    %c0_i32 = arith.constant 0 : i32
    %c0_i32_0 = arith.constant 0 : i32
    return %arg0, %c0_i32 : i32, i32
  }
  func.func @transform_4(%arg0: i32) -> (i32, i32) {
    %c0_i32 = arith.constant 0 : i32
    %c0_i32_0 = arith.constant 0 : i32
    return %arg0, %c0_i32 : i32, i32
  }
}

module attributes {stable_mosaic.version = 11 : i64} {
  func.func @_layernorm_kernel(%arg0: i32, %arg1: memref<32x64xf32, #tpu.memory_space<vmem>>, %arg2: memref<1x64xf32, #tpu.memory_space<vmem>>, %arg3: memref<1x64xf32, #tpu.memory_space<vmem>>, %arg4: memref<32x64xf32, #tpu.memory_space<vmem>>) attributes {dimension_semantics = [#tpu.dimension_semantics<parallel>], iteration_bounds = array<i64: 1>, scalar_prefetch = 0 : i64, scratch_operands = 0 : i64, tpu.core_type = #tpu.core_type<tc>, window_params = [{transform_indices = @transform_0, window_bounds = array<i64: 32, 64>}, {pipeline_mode = #tpu.pipeline_mode<synchronous>, transform_indices = @transform_1, window_bounds = array<i64: 1, 64>}, {pipeline_mode = #tpu.pipeline_mode<synchronous>, transform_indices = @transform_2, window_bounds = array<i64: 1, 64>}, {transform_indices = @transform_3, window_bounds = array<i64: 32, 64>}]} {
    %c0 = arith.constant 0 : index
    %c0_0 = arith.constant 0 : index
    %0 = vector.load %arg1[%c0, %c0_0] : memref<32x64xf32, #tpu.memory_space<vmem>>, vector<32x64xf32>
    %c0_1 = arith.constant 0 : index
    %c0_2 = arith.constant 0 : index
    %1 = vector.load %arg2[%c0_1, %c0_2] : memref<1x64xf32, #tpu.memory_space<vmem>>, vector<1x64xf32>
    %c0_3 = arith.constant 0 : index
    %c0_4 = arith.constant 0 : index
    %2 = vector.load %arg3[%c0_3, %c0_4] : memref<1x64xf32, #tpu.memory_space<vmem>>, vector<1x64xf32>
    %cst = arith.constant dense<0.000000e+00> : vector<32xf32>
    %3 = vector.multi_reduction <add>, %0, %cst [1] : vector<32x64xf32> to vector<32xf32>
    %4 = vector.shape_cast %3 : vector<32xf32> to vector<32x1xf32>
    %cst_5 = arith.constant 6.400000e+01 : f32
    %5 = vector.broadcast %cst_5 : f32 to vector<32x1xf32>
    %6 = arith.divf %4, %5 : vector<32x1xf32>
    %7 = vector.broadcast %6 : vector<32x1xf32> to vector<32x64xf32>
    %8 = arith.subf %0, %7 : vector<32x64xf32>
    %9 = arith.mulf %8, %8 : vector<32x64xf32>
    %cst_6 = arith.constant dense<0.000000e+00> : vector<32xf32>
    %10 = vector.multi_reduction <add>, %9, %cst_6 [1] : vector<32x64xf32> to vector<32xf32>
    %11 = vector.shape_cast %10 : vector<32xf32> to vector<32x1xf32>
    %cst_7 = arith.constant 6.400000e+01 : f32
    %12 = vector.broadcast %cst_7 : f32 to vector<32x1xf32>
    %13 = arith.divf %11, %12 : vector<32x1xf32>
    %14 = vector.broadcast %6 : vector<32x1xf32> to vector<32x64xf32>
    %15 = arith.subf %0, %14 : vector<32x64xf32>
    %cst_8 = arith.constant 9.99999974E-6 : f32
    %16 = vector.broadcast %cst_8 : f32 to vector<32x1xf32>
    %17 = arith.addf %13, %16 : vector<32x1xf32>
    %18 = math.rsqrt %17 : vector<32x1xf32>
    %19 = vector.broadcast %18 : vector<32x1xf32> to vector<32x64xf32>
    %20 = arith.mulf %15, %19 : vector<32x64xf32>
    %21 = vector.broadcast %1 : vector<1x64xf32> to vector<32x64xf32>
    %22 = arith.mulf %20, %21 : vector<32x64xf32>
    %23 = vector.broadcast %2 : vector<1x64xf32> to vector<32x64xf32>
    %24 = arith.addf %22, %23 : vector<32x64xf32>
    %c0_9 = arith.constant 0 : index
    %c0_10 = arith.constant 0 : index
    %25 = vector.load %arg4[%c0_9, %c0_10] : memref<32x64xf32, #tpu.memory_space<vmem>>, vector<32x64xf32>
    tpu.vector_store %arg4[%c0_9, %c0_10], %24 {strides = array<i32>} : memref<32x64xf32, #tpu.memory_space<vmem>>, vector<32x64xf32>,
    return
  }
  func.func @transform_0(%arg0: i32) -> (i32, i32) {
    %c0_i32 = arith.constant 0 : i32
    %c0_i32_0 = arith.constant 0 : i32
    return %arg0, %c0_i32 : i32, i32
  }
  func.func @transform_1(%arg0: i32) -> (i32, i32) {
    %c0_i32 = arith.constant 0 : i32
    %c0_i32_0 = arith.constant 0 : i32
    %c0_i32_1 = arith.constant 0 : i32
    return %c0_i32, %c0_i32_0 : i32, i32
  }
  func.func @transform_2(%arg0: i32) -> (i32, i32) {
    %c0_i32 = arith.constant 0 : i32
    %c0_i32_0 = arith.constant 0 : i32
    %c0_i32_1 = arith.constant 0 : i32
    return %c0_i32, %c0_i32_0 : i32, i32
  }
  func.func @transform_3(%arg0: i32) -> (i32, i32) {
    %c0_i32 = arith.constant 0 : i32
    %c0_i32_0 = arith.constant 0 : i32
    return %arg0, %c0_i32 : i32, i32
  }
}

module attributes {stable_mosaic.version = 11 : i64} {
  func.func @_linear_residual_kernel(%arg0: i32, %arg1: memref<32x256xbf16, #tpu.memory_space<vmem>>, %arg2: memref<256x64xbf16, #tpu.memory_space<vmem>>, %arg3: memref<1x64xf32, #tpu.memory_space<vmem>>, %arg4: memref<32x64xf32, #tpu.memory_space<vmem>>, %arg5: memref<32x64xf32, #tpu.memory_space<vmem>>) attributes {dimension_semantics = [#tpu.dimension_semantics<parallel>], iteration_bounds = array<i64: 1>, scalar_prefetch = 0 : i64, scratch_operands = 0 : i64, tpu.core_type = #tpu.core_type<tc>, window_params = [{transform_indices = @transform_0, window_bounds = array<i64: 32, 256>}, {pipeline_mode = #tpu.pipeline_mode<synchronous>, transform_indices = @transform_1, window_bounds = array<i64: 256, 64>}, {pipeline_mode = #tpu.pipeline_mode<synchronous>, transform_indices = @transform_2, window_bounds = array<i64: 1, 64>}, {transform_indices = @transform_3, window_bounds = array<i64: 32, 64>}, {transform_indices = @transform_4, window_bounds = array<i64: 32, 64>}]} {
    %c0 = arith.constant 0 : index
    %c0_0 = arith.constant 0 : index
    %0 = vector.load %arg1[%c0, %c0_0] : memref<32x256xbf16, #tpu.memory_space<vmem>>, vector<32x256xbf16>
    %c0_1 = arith.constant 0 : index
    %c0_2 = arith.constant 0 : index
    %1 = vector.load %arg2[%c0_1, %c0_2] : memref<256x64xbf16, #tpu.memory_space<vmem>>, vector<256x64xbf16>
    %cst = arith.constant dense<0.000000e+00> : vector<32x64xf32>
    %2 = tpu.matmul %0, %1, %cst {dimension_numbers = #tpu.dot_dimension_numbers<[1], [0], [0], [1], [0, 0, 1, 1], [], []>} : vector<32x256xbf16>, vector<256x64xbf16>, vector<32x64xf32> -> vector<32x64xf32>
    %c0_3 = arith.constant 0 : index
    %c0_4 = arith.constant 0 : index
    %3 = vector.load %arg3[%c0_3, %c0_4] : memref<1x64xf32, #tpu.memory_space<vmem>>, vector<1x64xf32>
    %4 = vector.broadcast %3 : vector<1x64xf32> to vector<32x64xf32>
    %5 = arith.addf %2, %4 : vector<32x64xf32>
    %c0_5 = arith.constant 0 : index
    %c0_6 = arith.constant 0 : index
    %6 = vector.load %arg4[%c0_5, %c0_6] : memref<32x64xf32, #tpu.memory_space<vmem>>, vector<32x64xf32>
    %7 = arith.addf %5, %6 : vector<32x64xf32>
    %c0_7 = arith.constant 0 : index
    %c0_8 = arith.constant 0 : index
    %8 = vector.load %arg5[%c0_7, %c0_8] : memref<32x64xf32, #tpu.memory_space<vmem>>, vector<32x64xf32>
    tpu.vector_store %arg5[%c0_7, %c0_8], %7 {strides = array<i32>} : memref<32x64xf32, #tpu.memory_space<vmem>>, vector<32x64xf32>,
    return
  }
  func.func @transform_0(%arg0: i32) -> (i32, i32) {
    %c0_i32 = arith.constant 0 : i32
    %c0_i32_0 = arith.constant 0 : i32
    return %arg0, %c0_i32 : i32, i32
  }
  func.func @transform_1(%arg0: i32) -> (i32, i32) {
    %c0_i32 = arith.constant 0 : i32
    %c0_i32_0 = arith.constant 0 : i32
    %c0_i32_1 = arith.constant 0 : i32
    return %c0_i32, %c0_i32_0 : i32, i32
  }
  func.func @transform_2(%arg0: i32) -> (i32, i32) {
    %c0_i32 = arith.constant 0 : i32
    %c0_i32_0 = arith.constant 0 : i32
    %c0_i32_1 = arith.constant 0 : i32
    return %c0_i32, %c0_i32_0 : i32, i32
  }
  func.func @transform_3(%arg0: i32) -> (i32, i32) {
    %c0_i32 = arith.constant 0 : i32
    %c0_i32_0 = arith.constant 0 : i32
    return %arg0, %c0_i32 : i32, i32
  }
  func.func @transform_4(%arg0: i32) -> (i32, i32) {
    %c0_i32 = arith.constant 0 : i32
    %c0_i32_0 = arith.constant 0 : i32
    return %arg0, %c0_i32 : i32, i32
  }
}

</mosaic_0001>

<bundles_post_ra>
// kernel: transformer_encoder.13
= control target key start
LH: loop header
LB: loop body
LE: loop exit
PB: predicated region body
PF: predicated region fallthrough
CT: control target
= control target key end

     0   :  { %vm71_vm0 = vcmask 523264   ;;  %s252_s1 = inlined_call_operand.vmem [shape: bf16[64,64], index: 1, kind: input, shape index: {}]   ;;  %s253_s0 = inlined_call_operand.vmem [shape: bf16[32,64], index: 0, kind: input, shape index: {}]   ;;  %s254_s2 = inlined_call_operand.vmem [shape: f32[1,64], index: 2, kind: input, shape index: {}]   ;;  %s255_s3 = inlined_call_operand.vmem [shape: f32[32,64], index: 3, kind: input, shape index: {}]   ;;  %s256_s4 = inlined_call_operand.vmem [shape: f32[32,64], index: 4, kind: output, shape index: {}]  }
   0x1   :  { %v170_v0 = vld [vmem:[%s252_s1] sm:$0xff]   ;;  %v171_v1 = vld [vmem:[%s252_s1 + $0x8] sm:$0xff]   ;;  %v172_v2 = vld [vmem:[%s252_s1 + $0x10] sm:$0xff]  }
   0x2   :  { %158 = vmatprep.subr.bf16.mxu0 %v170_v0  ;;  %v174_v3 = vld [vmem:[%s253_s0] sm:$0xff]   ;;  %v173_v4 = vld [vmem:[%s252_s1 + $0x18] sm:$0xff]   ;;  %v175_v5 = vld [vmem:[%s253_s0 + $0x8] sm:$0xff]  }
   0x3   :  { %159 = vmatpush3.bf16.msra.mxu0 %v170_v0  ;;  %166 = vmatprep.mubr.msk.bf16.mxu0 %vm71_vm0, %v174_v3  ;;  %v143_v6 = vld [vmem:[%s254_s2] ss:$0 sm:$0xff]  ;;  %v129_v8 = vld [vmem:[%s255_s3 + $0x10] sm:$0xff]  ;;  %v130_v14 = vld [vmem:[%s255_s3 + $0x18] sm:$0xff] }
   0x4   :  { %160 = vmatprep.subr.bf16.mxu0 %v171_v1  ;;  %v127_v11 = vld [vmem:[%s255_s3] sm:$0xff]  ;;  %v128_v18 = vld [vmem:[%s255_s3 + $0x8] sm:$0xff] }
   0x7   :  { %161 = vmatpush3.bf16.msra.mxu0 %v171_v1 }
   0x8   :  { %162 = vmatprep.subr.bf16.mxu0 %v172_v2 }
   0xb   :  { %163 = vmatpush3.bf16.msra.mxu0 %v172_v2 }
   0xc   :  { %164 = vmatprep.subr.bf16.mxu0 %v173_v4 }
   0xf   :  { %165 = vmatpush3.bf16.msra.mxu0 %v173_v4 }
  0x12   :  { %167 = vmatmul.mubr.msk.bf16.vlgmr.msra.gmra.mrb[0].mxu0 %vm71_vm0, %v175_v5 }
  0xe5   :  { %v168_v7 = vpop.f32.mrb[0].mxu0 }
  0xe6   :  { %v121_v9 = vadd.f32 %v168_v7, %v143_v6  ;;  %v112_v10 = vpop.f32.mrb[1].mxu0 }
  0xe7   :  { %v113_v12 = vadd.f32 %v143_v6, %v112_v10  ;;  %v169_v13 = vpop.f32.mrb[2].mxu0 }
  0xe8   :  { %v133_v15 = vadd.f32 %v129_v8, %v121_v9  ;;  %v124_v16 = vadd.f32 %v169_v13, %v143_v6  ;;  %v115_v17 = vpop.f32.mrb[3].mxu0 }
  0xe9   :  { %v131_v19 = vadd.f32 %v127_v11, %v113_v12  ;;  %v116_v20 = vadd.f32 %v143_v6, %v115_v17 }
  0xea   :  { %137 = vst.msk [vmem:[%s256_s4 + $0x10] sm:$0xff] %vm71_vm0, %v133_v15  ;;  %v134_v21 = vadd.f32 %v130_v14, %v124_v16 }
  0xeb   :  { %135 = vst.msk [vmem:[%s256_s4] sm:$0xff] %vm71_vm0, %v131_v19  ;;  %v132_v22 = vadd.f32 %v128_v18, %v116_v20 }
  0xec   :  { %138 = vst.msk [vmem:[%s256_s4 + $0x18] sm:$0xff] %vm71_vm0, %v134_v21 }
  0xed   :  { %136 = vst.msk [vmem:[%s256_s4 + $0x8] sm:$0xff] %vm71_vm0, %v132_v22 }

// kernel: transformer_encoder.14
= control target key start
LH: loop header
LB: loop body
LE: loop exit
PB: predicated region body
PF: predicated region fallthrough
CT: control target
= control target key end

     0   :  { %vm27_vm0 = vcmask 523264   ;;  %v311_v36 = vmov 0   ;;  %s429_s0 = inlined_call_operand.vmem [shape: f32[32,64], index: 0, kind: input, shape index: {}]   ;;  %s430_s3 = inlined_call_operand.vmem [shape: bf16[64,256], index: 3, kind: input, shape index: {}]   ;;  %s431_s1 = inlined_call_operand.vmem [shape: f32[1,64], index: 1, kind: input, shape index: {}]   ;;  %s432_s2 = inlined_call_operand.vmem [shape: f32[1,64], index: 2, kind: input, shape index: {}]   ;;  %s433_s4 = inlined_call_operand.vmem [shape: f32[1,256], index: 4, kind: input, shape index: {}]   ;;  %s434_s5 = inlined_call_operand.vmem [shape: bf16[32,256], index: 5, kind: output, shape index: {}]  }
   0x1   :  { %v21_v0 = vld [vmem:[%s429_s0] sm:$0xff]  ;;  %v23_v1 = vld [vmem:[%s429_s0 + $0x10] sm:$0xff]  ;;  %v22_v2 = vld [vmem:[%s429_s0 + $0x8] sm:$0xff]  ;;  %201 = vmatprep.mubr.bf16.mxu0 %v311_v36  ;;  %211 = vmatprep.mubr.bf16.mxu1 %v311_v36 }
   0x2   :  { %v28_v3 = vsel %vm27_vm0, %v21_v0, 0.0  ;;  %v34_v4 = vsel %vm27_vm0, %v23_v1, 0.0  ;;  %v24_v5 = vld [vmem:[%s429_s0 + $0x18] sm:$0xff]  ;;  %v31_v6 = vsel %vm27_vm0, %v22_v2, 0.0  ;;  %v291_v28 = vld [vmem:[%s430_s3 + $0x4] ss:$8 sps:$4 sm:$0xff]  }
   0x3   :  { %29 = vadd.xlane.f32.xlu0 %v28_v3  ;;  %35 = vadd.xlane.f32.xlu1 %v34_v4  ;;  %v37_v7 = vsel %vm27_vm0, %v24_v5, 0.0  ;;  %v293_v29 = vld [vmem:[%s430_s3] ss:$8 sps:$4 sm:$0xff]   ;;  %v294_v30 = vld [vmem:[%s430_s3 + $0x14] ss:$8 sps:$4 sm:$0xff]  }
   0x4   :  { %169 = vmatprep.subr.bf16.mxu0 %v291_v28  ;;  %282 = vmatprep.subr.bf16.mxu1 %v291_v28  ;;  %v296_v31 = vld [vmem:[%s430_s3 + $0x10] ss:$8 sps:$4 sm:$0xff]   ;;  %v297_v32 = vld [vmem:[%s430_s3 + $0x24] ss:$8 sps:$4 sm:$0xff]   ;;  %v299_v33 = vld [vmem:[%s430_s3 + $0x20] ss:$8 sps:$4 sm:$0xff]  }
   0x5   :  { %170 = vmatpush1.bf16.msra.mxu0 %v293_v29  ;;  %286 = vmatpush1.bf16.msra.mxu1 %v293_v29  ;;  %v300_v34 = vld [vmem:[%s430_s3 + $0x34] ss:$8 sps:$4 sm:$0xff]   ;;  %v302_v35 = vld [vmem:[%s430_s3 + $0x30] ss:$8 sps:$4 sm:$0xff]   ;;  %v262_v51 = vld [vmem:[%s431_s1] ss:$0 sm:$0xff] }
   0x6   :  { %171 = vmatprep.subr.bf16.mxu0 %v294_v30  ;;  %283 = vmatprep.subr.bf16.mxu1 %v294_v30  ;;  %v263_v57 = vld [vmem:[%s432_s2] ss:$0 sm:$0xff] }
   0x7   :  { %32 = vadd.xlane.f32.xlu0 %v31_v6  ;;  %38 = vadd.xlane.f32.xlu1 %v37_v7 }
   0x9   :  { %172 = vmatpush1.bf16.msra.mxu0 %v296_v31  ;;  %287 = vmatpush1.bf16.msra.mxu1 %v296_v31 }
   0xa   :  { %173 = vmatprep.subr.bf16.mxu0 %v297_v32  ;;  %284 = vmatprep.subr.bf16.mxu1 %v297_v32 }
   0xd   :  { %174 = vmatpush1.bf16.msra.mxu0 %v299_v33  ;;  %288 = vmatpush1.bf16.msra.mxu1 %v299_v33 }
   0xe   :  { %175 = vmatprep.subr.bf16.mxu0 %v300_v34  ;;  %285 = vmatprep.subr.bf16.mxu1 %v300_v34 }
  0x11   :  { %176 = vmatpush1.bf16.msra.mxu0 %v302_v35  ;;  %289 = vmatpush1.bf16.msra.mxu1 %v302_v35 }
  0x90   :  { %v30_v8 = vpop.xlane.xlu0 %29  ;;  %v36_v9 = vpop.xlane.xlu1 %35 }
  0x91   :  { %v41_v10 = vmul.f32 0.015625, %v30_v8  ;;  %v43_v11 = vmul.f32 0.015625, %v36_v9  ;;  %v111_v8 = vld [vmem:[%s433_s4] sm:$0x3] }
  0x93   :  { %v358_v12 = vsub.f32 %v21_v0, %v41_v10  ;;  %v360_v13 = vsub.f32 %v23_v1, %v43_v11 }
  0x94   :  { %v33_v14 = vpop.xlane.xlu0 %32  ;;  %v39_v15 = vpop.xlane.xlu1 %38 }
  0x95   :  { %v42_v16 = vmul.f32 0.015625, %v33_v14  ;;  %v44_v17 = vmul.f32 0.015625, %v39_v15  ;;  %v49_v18 = vmul.f32 %v358_v12, %v358_v12  ;;  %v51_v19 = vmul.f32 %v360_v13, %v360_v13 }
  0x97   :  { %v366_v20 = vsub.f32 %v22_v2, %v42_v16  ;;  %v368_v21 = vsub.f32 %v24_v5, %v44_v17  ;;  %v53_v22 = vsel %vm27_vm0, %v49_v18, 0.0  ;;  %v59_v23 = vsel %vm27_vm0, %v51_v19, 0.0 }
  0x98   :  { %54 = vadd.xlane.f32.xlu0 %v53_v22  ;;  %v113_v5 = vlaneseq }
  0x99   :  { %v50_v24 = vmul.f32 %v366_v20, %v366_v20  ;;  %v52_v25 = vmul.f32 %v368_v21, %v368_v21 }
  0x9a   :  { %v114_v6 = vshrl.u32 %v113_v5, 7 }
  0x9b   :  { %v56_v26 = vsel %vm27_vm0, %v50_v24, 0.0  ;;  %v62_v27 = vsel %vm27_vm0, %v52_v25, 0.0 }
  0x9c   :  { %60 = vadd.xlane.f32.xlu0 %v59_v23  ;;  %57 = vadd.xlane.f32.xlu1 %v56_v26  ;;  %v115_v7 = vsub.s32 0, %v114_v6  ;;  %v119_v9 = vsub.s32 1, %v114_v6 }
  0x9e   :  { %v116_v10 = vrot.slane %v111_v8, %v115_v7  ;;  %v120_v11 = vrot.slane %v111_v8, %v119_v9 }
  0xa0   :  { %63 = vadd.xlane.f32.xlu1 %v62_v27 }
 0x125   :  { %v55_v37 = vpop.xlane.xlu0 %54 }
 0x126   :  { %v65_v38 = vmul.f32 0.015625, %v55_v37 }
 0x128   :  { %v69_v39 = vadd.f32 1e-05, %v65_v38 }
 0x129   :  { %v58_v40 = vpop.xlane.xlu1 %57  ;;  %v61_v41 = vpop.xlane.xlu0 %60 }
 0x12a   :  { %303 = vrsqrt.f32 %v69_v39  ;;  %v66_v42 = vmul.f32 0.015625, %v58_v40  ;;  %v67_v43 = vmul.f32 0.015625, %v61_v41 }
 0x12c   :  { %v70_v44 = vadd.f32 1e-05, %v66_v42  ;;  %v71_v45 = vadd.f32 1e-05, %v67_v43 }
 0x12d   :  { %v64_v46 = vpop.xlane.xlu1 %63 }
 0x12e   :  { %305 = vrsqrt.f32 %v70_v44  ;;  %v68_v47 = vmul.f32 0.015625, %v64_v46 }
 0x12f   :  { %307 = vrsqrt.f32 %v71_v45 }
 0x130   :  { %v72_v48 = vadd.f32 1e-05, %v68_v47 }
 0x132   :  { %309 = vrsqrt.f32 %v72_v48 }
 0x134   :  { %v304_v49 = vpop.eup %303 }
 0x135   :  { %v77_v50 = vmul.f32 %v304_v49, %v358_v12 }
 0x137   :  { %v87_v55 = vmul.f32 %v262_v51, %v77_v50 }
 0x138   :  { %v306_v52 = vpop.eup %305 }
 0x139   :  { %v308_v53 = vpop.eup %307  ;;  %v78_v54 = vmul.f32 %v306_v52, %v366_v20  ;;  %v97_v61 = vadd.f32 %v263_v57, %v87_v55 }
 0x13a   :  { %v79_v56 = vmul.f32 %v308_v53, %v360_v13 }
 0x13b   :  { %v88_v58 = vmul.f32 %v262_v51, %v78_v54 }
 0x13c   :  { %v310_v59 = vpop.eup %309  ;;  %v89_v63 = vmul.f32 %v262_v51, %v79_v56 }
 0x13d   :  { %v80_v60 = vmul.f32 %v310_v59, %v368_v21  ;;  %v98_v62 = vadd.f32 %v263_v57, %v88_v58 }
 0x13e   :  { %v99_v2 = vadd.f32 %v263_v57, %v89_v63 }
 0x13f   :  { %v101_v0 = vpack.c.bf16 %v98_v62, %v97_v61  ;;  %v90_v1 = vmul.f32 %v262_v51, %v80_v60 }
 0x141   :  { %272 = vmatmul.mubr.msk.bf16.vlgmr.msra.gmra.mrb[0].mxu0 %vm27_vm0, %v101_v0  ;;  %v100_v3 = vadd.f32 %v263_v57, %v90_v1 }
 0x143   :  { %v102_v4 = vpack.c.bf16 %v100_v3, %v99_v2 }
 0x145   :  { %273 = vmatmul.mubr.msk.bf16.vlgmr.msra.gmra.mrb[0].mxu1 %vm27_vm0, %v102_v4 }
 0x214   :  { %v203_v12 = vpop.f32.mrb[0].mxu0 }
 0x215   :  { %v204_v13 = vadd.f32 %v203_v12, %v116_v10  ;;  %v205_v14 = vpop.f32.mrb[1].mxu0 }
 0x216   :  { %v206_v15 = vadd.f32 %v205_v14, %v120_v11  ;;  %v207_v16 = vpop.f32.mrb[2].mxu0 }
 0x217   :  { %v222_v17 = vmax.f32 %v204_v13, 0.0  ;;  %v208_v18 = vadd.f32 %v207_v16, %v116_v10  ;;  %v209_v19 = vpop.f32.mrb[3].mxu0 }
 0x218   :  { %v223_v20 = vmax.f32 %v206_v15, 0.0  ;;  %v210_v21 = vadd.f32 %v209_v19, %v120_v11  ;;  %v213_v22 = vpop.f32.mrb[0].mxu1 }
 0x219   :  { %v224_v23 = vmax.f32 %v208_v18, 0.0  ;;  %v214_v24 = vadd.f32 %v213_v22, %v116_v10  ;;  %v215_v25 = vpop.f32.mrb[1].mxu1 }
 0x21a   :  { %v278_v26 = vpack.c.bf16 %v223_v20, %v222_v17  ;;  %v225_v27 = vmax.f32 %v210_v21, 0.0  ;;  %v216_v28 = vadd.f32 %v215_v25, %v120_v11  ;;  %v217_v29 = vpop.f32.mrb[2].mxu1 }
 0x21b   :  { %v226_v30 = vmax.f32 %v214_v24, 0.0  ;;  %v218_v31 = vadd.f32 %v217_v29, %v116_v10  ;;  %v219_v32 = vpop.f32.mrb[3].mxu1 }
 0x21c   :  { %254 = vst [vmem:[%s434_s5] sm:$0xff] %v278_v26  ;;  %v279_v33 = vpack.c.bf16 %v225_v27, %v224_v23  ;;  %v227_v34 = vmax.f32 %v216_v28, 0.0  ;;  %v220_v35 = vadd.f32 %v219_v32, %v120_v11 }
 0x21d   :  { %v228_v36 = vmax.f32 %v218_v31, 0.0 }
 0x21e   :  { %255 = vst [vmem:[%s434_s5 + $0x8] sm:$0xff] %v279_v33  ;;  %v280_v37 = vpack.c.bf16 %v227_v34, %v226_v30  ;;  %v229_v38 = vmax.f32 %v220_v35, 0.0 }
 0x220   :  { %256 = vst [vmem:[%s434_s5 + $0x10] sm:$0xff] %v280_v37  ;;  %v281_v39 = vpack.c.bf16 %v229_v38, %v228_v36 }
 0x222   :  { %257 = vst [vmem:[%s434_s5 + $0x18] sm:$0xff] %v281_v39 }

// kernel: transformer_encoder.11
= control target key start
LH: loop header
LB: loop body
LE: loop exit
PB: predicated region body
PF: predicated region fallthrough
CT: control target
= control target key end

     0   :  { %vm39_vm0 = vcmask 523264   ;;  %vm329_vm1 = vcmask 519168   ;;  %s467_s12 = smov 64   ;;  %s663_s0 = inlined_call_operand.vmem [shape: f32[32,64], index: 0, kind: input, shape index: {}]   ;;  %s664_s6 = inlined_call_operand.vmem [shape: bf16[64,64], index: 6, kind: input, shape index: {}]   ;;  %s665_s4 = inlined_call_operand.vmem [shape: bf16[64,128], index: 4, kind: input, shape index: {}]   ;;  %s666_s2 = inlined_call_operand.vmem [shape: f32[1,64], index: 2, kind: input, shape index: {}]   ;;  %s667_s3 = inlined_call_operand.vmem [shape: f32[1,64], index: 3, kind: input, shape index: {}]   ;;  %s668_s1 = inlined_call_operand.vmem [shape: f32[32,64], index: 1, kind: input, shape index: {}]   ;;  %s669_s7 = inlined_call_operand.vmem [shape: f32[1,64], index: 7, kind: input, shape index: {}]   ;;  %s670_s5 = inlined_call_operand.vmem [shape: f32[1,128], index: 5, kind: input, shape index: {}]   ;;  %s671_s10 = inlined_call_operand.vmem [shape: bf16[32,64], index: 10, kind: output, shape index: {2}]   ;;  %s672_s8 = inlined_call_operand.vmem [shape: bf16[32,64], index: 8, kind: output, shape index: {0}]   ;;  %s673_s9 = inlined_call_operand.vmem [shape: bf16[32,64], index: 9, kind: output, shape index: {1}]  }
   0x1   :  { %v33_v0 = vld [vmem:[%s663_s0] sm:$0xff]  ;;  %v35_v1 = vld [vmem:[%s663_s0 + $0x10] sm:$0xff]  ;;  %v34_v2 = vld [vmem:[%s663_s0 + $0x8] sm:$0xff] }
   0x2   :  { %v40_v3 = vsel %vm39_vm0, %v33_v0, 0.0  ;;  %v46_v4 = vsel %vm39_vm0, %v35_v1, 0.0  ;;  %v36_v5 = vld [vmem:[%s663_s0 + $0x18] sm:$0xff]  ;;  %v43_v6 = vsel %vm39_vm0, %v34_v2, 0.0  ;;  %v451_v28 = vld [vmem:[%s664_s6] sm:$0xff]   ;;  %v453_v30 = vld [vmem:[%s664_s6 + $0x8] sm:$0xff]  }
   0x3   :  { %41 = vadd.xlane.f32.xlu0 %v40_v3  ;;  %47 = vadd.xlane.f32.xlu1 %v46_v4  ;;  %v49_v7 = vsel %vm39_vm0, %v36_v5, 0.0  ;;  %v452_v29 = vld [vmem:[%s665_s4] sm:$0xff]   ;;  %v454_v31 = vld [vmem:[%s665_s4 + $0x8] sm:$0xff]   ;;  %v455_v32 = vld [vmem:[%s664_s6 + $0x10] sm:$0xff]  }
   0x4   :  { %438 = vmatprep.subr.bf16.mxu1 %v451_v28  ;;  %426 = vmatprep.subr.bf16.mxu0 %v452_v29  ;;  %v456_v33 = vld [vmem:[%s665_s4 + $0x10] sm:$0xff]   ;;  %v457_v34 = vld [vmem:[%s664_s6 + $0x18] sm:$0xff]   ;;  %v382_v49 = vld [vmem:[%s666_s2] ss:$0 sm:$0xff] }
   0x5   :  { %439 = vmatpush3.bf16.msra.mxu1 %v451_v28  ;;  %427 = vmatpush3.bf16.msra.mxu0 %v452_v29  ;;  %v458_v35 = vld [vmem:[%s665_s4 + $0x18] sm:$0xff]   ;;  %v383_v51 = vld [vmem:[%s667_s3] ss:$0 sm:$0xff]  ;;  %v114_v61 = vld [vmem:[%s668_s1 + $0x8] sm:$0xff] }
   0x6   :  { %440 = vmatprep.subr.bf16.mxu1 %v453_v30  ;;  %428 = vmatprep.subr.bf16.mxu0 %v454_v31  ;;  %v113_v59 = vld [vmem:[%s668_s1] sm:$0xff] }
   0x7   :  { %44 = vadd.xlane.f32.xlu0 %v43_v6  ;;  %50 = vadd.xlane.f32.xlu1 %v49_v7  ;;  %v115_v6 = vld [vmem:[%s668_s1 + $0x10] sm:$0xff]  ;;  %v116_v7 = vld [vmem:[%s668_s1 + $0x18] sm:$0xff] }
   0x9   :  { %441 = vmatpush3.bf16.msra.mxu1 %v453_v30  ;;  %429 = vmatpush3.bf16.msra.mxu0 %v454_v31 }
   0xa   :  { %442 = vmatprep.subr.bf16.mxu1 %v455_v32  ;;  %430 = vmatprep.subr.bf16.mxu0 %v456_v33 }
   0xd   :  { %443 = vmatpush3.bf16.msra.mxu1 %v455_v32  ;;  %431 = vmatpush3.bf16.msra.mxu0 %v456_v33 }
   0xe   :  { %444 = vmatprep.subr.bf16.mxu1 %v457_v34  ;;  %432 = vmatprep.subr.bf16.mxu0 %v458_v35 }
  0x11   :  { %445 = vmatpush3.bf16.msra.mxu1 %v457_v34  ;;  %433 = vmatpush3.bf16.msra.mxu0 %v458_v35 }
  0x90   :  { %v42_v8 = vpop.xlane.xlu0 %41  ;;  %v48_v9 = vpop.xlane.xlu1 %47 }
  0x91   :  { %v53_v10 = vmul.f32 0.015625, %v42_v8  ;;  %v55_v11 = vmul.f32 0.015625, %v48_v9 }
  0x93   :  { %v539_v12 = vsub.f32 %v33_v0, %v53_v10  ;;  %v541_v13 = vsub.f32 %v35_v1, %v55_v11 }
  0x94   :  { %v45_v14 = vpop.xlane.xlu0 %44  ;;  %v51_v15 = vpop.xlane.xlu1 %50 }
  0x95   :  { %v54_v16 = vmul.f32 0.015625, %v45_v14  ;;  %v56_v17 = vmul.f32 0.015625, %v51_v15  ;;  %v61_v18 = vmul.f32 %v539_v12, %v539_v12  ;;  %v63_v19 = vmul.f32 %v541_v13, %v541_v13  ;;  %v391_v14 = vld [vmem:[%s669_s7] ss:$0 sm:$0xff] }
  0x97   :  { %v547_v20 = vsub.f32 %v34_v2, %v54_v16  ;;  %v549_v21 = vsub.f32 %v36_v5, %v56_v17  ;;  %v65_v22 = vsel %vm39_vm0, %v61_v18, 0.0  ;;  %v71_v23 = vsel %vm39_vm0, %v63_v19, 0.0  ;;  %v384_v16 = vld [vmem:[%s670_s5] ss:$0 sm:$0xff] }
  0x98   :  { %66 = vadd.xlane.f32.xlu0 %v65_v22 }
  0x99   :  { %v62_v24 = vmul.f32 %v547_v20, %v547_v20  ;;  %v64_v25 = vmul.f32 %v549_v21, %v549_v21 }
  0x9b   :  { %v68_v26 = vsel %vm39_vm0, %v62_v24, 0.0  ;;  %v74_v27 = vsel %vm39_vm0, %v64_v25, 0.0 }
  0x9c   :  { %72 = vadd.xlane.f32.xlu0 %v71_v23  ;;  %69 = vadd.xlane.f32.xlu1 %v68_v26 }
  0xa0   :  { %75 = vadd.xlane.f32.xlu1 %v74_v27 }
 0x125   :  { %v67_v36 = vpop.xlane.xlu0 %66 }
 0x126   :  { %v77_v37 = vmul.f32 0.015625, %v67_v36 }
 0x128   :  { %v81_v38 = vadd.f32 1e-05, %v77_v37 }
 0x129   :  { %v70_v39 = vpop.xlane.xlu1 %69  ;;  %v73_v40 = vpop.xlane.xlu0 %72 }
 0x12a   :  { %459 = vrsqrt.f32 %v81_v38  ;;  %v78_v41 = vmul.f32 0.015625, %v70_v39  ;;  %v79_v42 = vmul.f32 0.015625, %v73_v40 }
 0x12c   :  { %v82_v43 = vadd.f32 1e-05, %v78_v41  ;;  %v83_v44 = vadd.f32 1e-05, %v79_v42 }
 0x12d   :  { %v76_v45 = vpop.xlane.xlu1 %75 }
 0x12e   :  { %461 = vrsqrt.f32 %v82_v43  ;;  %v80_v46 = vmul.f32 0.015625, %v76_v45 }
 0x12f   :  { %463 = vrsqrt.f32 %v83_v44 }
 0x130   :  { %v84_v47 = vadd.f32 1e-05, %v80_v46 }
 0x132   :  { %465 = vrsqrt.f32 %v84_v47 }
 0x134   :  { %v460_v48 = vpop.eup %459 }
 0x135   :  { %v89_v50 = vmul.f32 %v460_v48, %v539_v12 }
 0x137   :  { %v99_v52 = vmul.f32 %v382_v49, %v89_v50 }
 0x138   :  { %v462_v53 = vpop.eup %461 }
 0x139   :  { %v464_v54 = vpop.eup %463  ;;  %v90_v55 = vmul.f32 %v462_v53, %v547_v20  ;;  %v109_v57 = vadd.f32 %v383_v51, %v99_v52 }
 0x13a   :  { %v91_v56 = vmul.f32 %v464_v54, %v541_v13 }
 0x13b   :  { %v100_v58 = vmul.f32 %v382_v49, %v90_v55  ;;  %v117_v1 = vadd.f32 %v113_v59, %v109_v57 }
 0x13c   :  { %v466_v60 = vpop.eup %465  ;;  %v101_v62 = vmul.f32 %v382_v49, %v91_v56 }
 0x13d   :  { %v92_v63 = vmul.f32 %v466_v60, %v549_v21  ;;  %v110_v0 = vadd.f32 %v383_v51, %v100_v58 }
 0x13e   :  { %v111_v5 = vadd.f32 %v383_v51, %v101_v62 }
 0x13f   :  { %v217_v2 = vpack.c.bf16 %v110_v0, %v109_v57  ;;  %v118_v3 = vadd.f32 %v114_v61, %v110_v0  ;;  %v102_v4 = vmul.f32 %v382_v49, %v92_v63 }
 0x140   :  { %v119_v11 = vadd.f32 %v115_v6, %v111_v5 }
 0x141   :  { %446 = vmatprep.mubr.msk.bf16.mxu1 %vm39_vm0, %v217_v2  ;;  %v121_v8 = vpack.c.bf16 %v118_v3, %v117_v1  ;;  %v112_v9 = vadd.f32 %v383_v51, %v102_v4 }
 0x143   :  { %434 = vmatprep.mubr.msk.bf16.mxu0 %vm39_vm0, %v121_v8  ;;  %v218_v10 = vpack.c.bf16 %v112_v9, %v111_v5  ;;  %v120_v12 = vadd.f32 %v116_v7, %v112_v9 }
 0x145   :  { %447 = vmatmul.mubr.msk.bf16.vlgmr.msra.gmra.mrb[0].mxu1 %vm39_vm0, %v218_v10  ;;  %v122_v13 = vpack.c.bf16 %v120_v12, %v119_v11 }
 0x147   :  { %435 = vmatmul.mubr.msk.bf16.vlgmr.msra.gmra.mrb[0].mxu0 %vm39_vm0, %v122_v13 }
 0x218   :  { %v448_v15 = vpop.f32.mrb[0].mxu1 }
 0x219   :  { %v307_v17 = vadd.f32 %v448_v15, %v391_v14  ;;  %v298_v18 = vpop.f32.mrb[1].mxu1 }
 0x21a   :  { %v299_v19 = vadd.f32 %v391_v14, %v298_v18  ;;  %v436_v20 = vpop.f32.mrb[0].mxu0  ;;  %v449_v21 = vpop.f32.mrb[2].mxu1 }
 0x21b   :  { %v412_v22 = vpack.c.bf16 %v307_v17, %v307_v17  ;;  %v211_v23 = vadd.f32 %v436_v20, %v384_v16  ;;  %v310_v24 = vadd.f32 %v449_v21, %v391_v14  ;;  %v202_v25 = vpop.f32.mrb[1].mxu0  ;;  %v301_v26 = vpop.f32.mrb[3].mxu1 }
 0x21c   :  { %v410_v27 = vpack.c.bf16 %v299_v19, %v299_v19  ;;  %v203_v28 = vadd.f32 %v384_v16, %v202_v25  ;;  %v302_v29 = vadd.f32 %v391_v14, %v301_v26  ;;  %v437_v30 = vpop.f32.mrb[2].mxu0 }
 0x21d   :  { %368 = vst.msk [vmem:[%s671_s10 + $0x8] sm:$0xf] %vm329_vm1, %v412_v22  ;;  %v408_v31 = vpack.c.bf16 %v211_v23, %v211_v23  ;;  %v413_v32 = vpack.c.bf16 %v310_v24, %v310_v24  ;;  %v214_v33 = vadd.f32 %v437_v30, %v384_v16  ;;  %v205_v34 = vpop.f32.mrb[3].mxu0 }
 0x21e   :  { %366 = vst.msk [vmem:[%s671_s10] sm:$0xf] %vm329_vm1, %v410_v27  ;;  %v406_v35 = vpack.c.bf16 %v203_v28, %v203_v28  ;;  %v411_v36 = vpack.c.bf16 %v302_v29, %v302_v29  ;;  %v206_v37 = vadd.f32 %v384_v16, %v205_v34 }
 0x21f   :  { %332 = vst.msk [vmem:[%s672_s8 + $0x8] sm:$0xf] %vm329_vm1, %v408_v31  ;;  %369 = vst.msk [vmem:[%s671_s10 + $0xc] sm:$0xf] %vm329_vm1, %v413_v32  ;;  %v409_v38 = vpack.c.bf16 %v214_v33, %v214_v33  ;;  %338 = vrot.lane.b32.xlu1 %v408_v31, %s467_s12 }
 0x220   :  { %330 = vst.msk [vmem:[%s672_s8] sm:$0xf] %vm329_vm1, %v406_v35  ;;  %367 = vst.msk [vmem:[%s671_s10 + $0x4] sm:$0xf] %vm329_vm1, %v411_v36  ;;  %v407_v39 = vpack.c.bf16 %v206_v37, %v206_v37  ;;  %334 = vrot.lane.b32.xlu0 %v406_v35, %s467_s12 }
 0x221   :  { %333 = vst.msk [vmem:[%s672_s8 + $0xc] sm:$0xf] %vm329_vm1, %v409_v38 }
 0x222   :  { %331 = vst.msk [vmem:[%s672_s8 + $0x4] sm:$0xf] %vm329_vm1, %v407_v39 }
 0x223   :  { %336 = vrot.lane.b32.xlu1 %v407_v39, %s467_s12 }
 0x227   :  { %340 = vrot.lane.b32.xlu1 %v409_v38, %s467_s12 }
 0x291   :  { %v339_v40 = vpop.permute.xlu1 %338 }
 0x292   :  { %348 = vst.msk [vmem:[%s673_s9 + $0x8] sm:$0xf] %vm329_vm1, %v339_v40  ;;  %v335_v41 = vpop.permute.xlu0 %334 }
 0x293   :  { %346 = vst.msk [vmem:[%s673_s9] sm:$0xf] %vm329_vm1, %v335_v41 }
 0x295   :  { %v337_v42 = vpop.permute.xlu1 %336 }
 0x296   :  { %347 = vst.msk [vmem:[%s673_s9 + $0x4] sm:$0xf] %vm329_vm1, %v337_v42 }
 0x299   :  { %v341_v43 = vpop.permute.xlu1 %340 }
 0x29a   :  { %349 = vst.msk [vmem:[%s673_s9 + $0xc] sm:$0xf] %vm329_vm1, %v341_v43 }

// kernel: transformer_encoder.12
= control target key start
LH: loop header
LB: loop body
LE: loop exit
PB: predicated region body
PF: predicated region fallthrough
CT: control target
= control target key end

     0   :  { %s1590_s15 = smov 0   ;;  %s1592_s16 = smov 0   ;;  %s1924_s0 = inlined_call_operand.vmem [shape: bf16[2,16,64], index: 0, kind: input, shape index: {}]   ;;  %s1925_s1 = inlined_call_operand.vmem [shape: bf16[2,16,64], index: 1, kind: input, shape index: {}]   ;;  %s1926_s2 = inlined_call_operand.vmem [shape: bf16[2,16,64], index: 2, kind: input, shape index: {}]   ;;  %s1927_s3 = inlined_call_operand.vmem [shape: f32[2,1,16], index: 3, kind: input, shape index: {}]   ;;  %s1928_s4 = inlined_call_operand.vmem [shape: bf16[2,16,64], index: 4, kind: output, shape index: {}]  }
   0x1   :  { %s1594_s17 = smov 0  }
   0x2 LB: > { %s29_s18 = sadd.s32 1, %s1546_s16  ;;  %p1329_p0 = scmp.ge.s32.totalorder %s1550_s17, 1  ;;  %s1550_s17 = sphi %s1594_s17, %s14_s17   ;;  %s1546_s16 = sphi %s1592_s16, %s1930_s16   ;;  %s1542_s15 = sphi %s1590_s15, %s1929_s15  }
   0x3   : > { %p31_p1 = scmp.ge.s32.totalorder %s29_s18, 2  ;;  %p237_p2 = scmp.lt.s32.totalorder %s1550_s17, 3 }
   0x5   : > { %s1932_s18 = smov (%p31_p1, %s29_s18), 0  ;;  %p238_p3 = pnand %p1329_p0, %p237_p2 }
   0x6   : > { %p296_p4 = scmp.lt.s32.totalorder (!%p238_p3), %s1542_s15, 1  ;;  %v1552_v0 = vmov (!%p238_p3), 0.0   ;;  %vm1553_vm0 = vmmov (!%p238_p3), 0   ;;  %vm377_vm1 = vcmask (!%p238_p3), 130048   ;;  %vm346_vm2 = vcmask (!%p238_p3), 31744   ;;  %s1556_s29 = smov (!%p238_p3), 112  }
   0x7   : > { %241 = sbr.rel (%p238_p3) target bundleno = 1599 (0x63f), region = 36  ;;  %1388 = vmatprep.subr.bf16.mxu0 (!%p238_p3), %v1552_v0  ;;  %1390 = vmatprep.mubr.msk.bf16.mxu0 (!%p238_p3), %vm1553_vm0, %v1552_v0  ;;  %v1554_v4 = vmov (!%p238_p3), -1e+30   ;;  %349 = vst.msk [vmem:[#allocation3] sm:$0xff] (!%p238_p3), %vm346_vm2, %v1552_v0  ;;  %350 = vst.msk [vmem:[#allocation3 + $0x8] sm:$0xff] (!%p238_p3), %vm346_vm2, %v1552_v0  ;;  %v1555_v14 = vmov (!%p238_p3), 0  }
   0x8   : > { %1394 = vmatprep.subr.bf16.mxu1 (!%p238_p3), %v1552_v0  ;;  %1396 = vmatprep.mubr.msk.bf16.mxu1 (!%p238_p3), %vm1553_vm0, %v1552_v0  ;;  %347 = vst.msk [vmem:[#allocation2] sm:$0xff] (!%p238_p3), %vm346_vm2, %v1554_v4  ;;  %348 = vst.msk [vmem:[#allocation2 + $0x8] sm:$0xff] (!%p238_p3), %vm346_vm2, %v1554_v4  ;;  %vm469_vm3 = vcmask (!%p238_p3), 7168   ;;  %s1557_s7 = smov (!%p238_p3), 96   ;;  %s1558_s8 = smov (!%p238_p3), 80   ;;  %vm638_vm4 = vcmask (!%p238_p3), 15368  }
   0x9   : > { %1473 = vset.pattern.permute.xlu1 (!%p238_p3), %v1555_v14  ;;  %vm813_vm5 = vcmask (!%p238_p3), 23568   ;;  %vm988_vm6 = vcmask (!%p238_p3), 31768   ;;  %vm351_vm7 = vcmask (!%p238_p3), 523264   ;;  %s1562_s9 = smov (!%p238_p3), 16   ;;  %s1563_s10 = smov (!%p238_p3), 32   ;;  %vm713_vm8 = vcmask (!%p238_p3), 261248  }
   0xa   : > { %352 = vst.msk [vmem:[#allocation4] sm:$0xff] (!%p238_p3), %vm351_vm7, %v1552_v0  ;;  %353 = vst.msk [vmem:[#allocation4 + $0x8] sm:$0xff] (!%p238_p3), %vm351_vm7, %v1552_v0  ;;  %s1564_s11 = smov (!%p238_p3), 48   ;;  %vm888_vm9 = vcmask (!%p238_p3), 392448   ;;  %vm1063_vm10 = vcmask (!%p238_p3), 523648   ;;  %vm1097_vm11 = vcmask (!%p238_p3), 125952  }
   0xb   : > { %vm1126_vm12 = vcmask (!%p238_p3), 257152   ;;  %vm1155_vm13 = vcmask (!%p238_p3), 388352   ;;  %vm1184_vm14 = vcmask (!%p238_p3), 519552  }
   0xe   : > { %s1934_s15 = smov (!%p296_p4, %s1542_s15), 1 }
   0xf   : > { %s1614_s19 = sshll.u32 %s1934_s15, 3  ;;  %s330_s28 = scalar_lea.vmem %s1927_s3, %s1934_s15  ;;  %v1642_v15 = vld [vmem:[#allocation2] sm:$0xff]  ;;  %v1647_v18 = vld [vmem:[#allocation2 + $0x8] sm:$0xff] }
  0x10   : > { %s313_s22 = scalar_lea.vmem %s1925_s1, %s1614_s19  ;;  %s303_s25 = scalar_lea.vmem %s1924_s0, %s1614_s19  ;;  %v1634_v5 = vld [vmem:[%s330_s28] ss:$0 sm:$0xff] }
  0x11   : > { %v1489_v1 = vld [vmem:[%s313_s22] sm:$0xff]   ;;  %s323_s6 = scalar_lea.vmem %s1926_s2, %s1614_s19  ;;  %s1897_s14 = scalar_lea.vmem %s1928_s4, %s1614_s19 }
  0x12   : > { %v382_v2 = vsel %vm377_vm1, %v1489_v1, 0  ;;  %v1490_v3 = vld [vmem:[%s303_s25] sm:$0xff]  }
  0x13   : > { %1389 = vmatpush3.bf16.xpose.msra.mxu0 %v382_v2  ;;  %v1667_v23 = vld [vmem:[%s323_s6] sm:$0xff]  }
  0x14   : > { %1406 = vmatprep.subr.bf16.mxu0 %v1552_v0  ;;  %1395 = vmatpush3.bf16.msra.mxu1 %v1667_v23 }
  0x15   : > { %1400 = vmatprep.subr.bf16.mxu1 %v1552_v0 }
  0x1a   : > { %1391 = vmatmul.mubr.msk.bf16.vlgmr.msra.gmra.mrb[0].mxu0 %vm377_vm1, %v1490_v3 }
  0x1b   : > { %1408 = vmatprep.mubr.msk.bf16.mxu0 %vm1553_vm0, %v1552_v0 }
  0xed   : > { %v418_v6 = vpop.f32.mrb[0].mxu0 }
  0xee   : > { %v419_v7 = vadd.f32 %v1634_v5, %v418_v6  ;;  %v1392_v8 = vpop.f32.mrb[1].mxu0 }
  0xef   : > { %v421_v9 = vpop.f32.mrb[2].mxu0 }
  0xf0   : > { %v422_v10 = vadd.f32 %v1634_v5, %v421_v9  ;;  %v1393_v11 = vpop.f32.mrb[3].mxu0  ;;  %v427_v12 = vsel %vm377_vm1, %v419_v7, -inf }
  0xf1   : > { %428 = vmax.xlane.f32.xlu0 %v427_v12 }
  0xf2   : > { %v430_v13 = vsel %vm377_vm1, %v422_v10, -inf }
  0xf5   : > { %431 = vmax.xlane.f32.xlu0 %v430_v13 }
 0x10b   : > { %545 = vrot.lane.b32.xlu0 %v1489_v1, %s1556_s29 }
 0x17e   : > { %v429_v16 = vpop.xlane.xlu0 %428 }
 0x17f   : > { %v1645_v17 = vmax.f32 %v1642_v15, %v429_v16 }
 0x181   : > { %v435_v19 = vsub.f32 %v1642_v15, %v1645_v17  ;;  %541 = vst.msk [vmem:[#allocation2] sm:$0xff] %vm469_vm3, %v1645_v17  ;;  %443 = vperm.xlu1 %1473, %v1645_v17  }
 0x182   : > { %v432_v20 = vpop.xlane.xlu0 %431 }
 0x183   : > { %v1655_v21 = vmax.f32 %v1647_v18, %v432_v20 }
 0x185   : > { %v436_v22 = vsub.f32 %v1647_v18, %v1655_v21  ;;  %542 = vst.msk [vmem:[#allocation2 + $0x8] sm:$0xff] %vm469_vm3, %v1655_v21  ;;  %448 = vperm.xlu1 %1473, %v1655_v21  }
 0x186   : > { %v546_v30 = vpop.permute.xlu0 %545 }
 0x187   : > { %v551_v34 = vsel %vm377_vm1, %v546_v30, 0 }
 0x188   : > { %v594_v9 = vld [vmem:[#allocation2] sm:$0xff] }
 0x189   : > { %543 = vrot.lane.b32.xlu1 %v1490_v3, %s1556_s29 }
 0x18d   : > { %720 = vrot.lane.b32.xlu1 %v1489_v1, %s1557_s7 }
 0x191   : > { %718 = vrot.lane.b32.xlu1 %v1490_v3, %s1557_s7 }
 0x195   : > { %895 = vrot.lane.b32.xlu1 %v1489_v1, %s1558_s8 }
 0x199   : > { %893 = vrot.lane.b32.xlu1 %v1490_v3, %s1558_s8 }
 0x200   : > { %v444_v24 = vpop.permute.xlu1 %443 }
 0x201   : > { %v451_v25 = vsub.f32 %v419_v7, %v444_v24  ;;  %v1559_v7 = vmov 1  }
 0x202   : > { %1474 = vset.pattern.permute.xlu0 %v1559_v7  ;;  %1475 = vset.pattern.permute.xlu1 %v1559_v7 }
 0x203   : > { %v453_v26 = vmul.f32 1.442695, %v451_v25  ;;  %v1560_v25 = vmov 2  }
 0x204   : > { %v449_v27 = vpop.permute.xlu1 %448 }
 0x205   : > { %v452_v28 = vsub.f32 %v422_v10, %v449_v27  ;;  %1492 = vpow2.f32 %v453_v26 }
 0x207   : > { %v455_v29 = vmul.f32 1.442695, %v452_v28 }
 0x208   : > { %v544_v31 = vpop.permute.xlu1 %543 }
 0x209   : > { %1494 = vpow2.f32 %v455_v29 }
 0x20c   : > { %v721_v36 = vpop.permute.xlu1 %720 }
 0x20d   : > { %v726_v38 = vsel %vm377_vm1, %v721_v36, 0 }
 0x20f   : > { %v1675_v32 = vpop.eup %1492 }
 0x210   : > { %v719_v37 = vpop.permute.xlu1 %718 }
 0x213   : > { %v1677_v33 = vpop.eup %1494 }
 0x214   : > { %v486_v35 = vpack.c.bf16 %v1677_v33, %v1675_v32  ;;  %v896_v39 = vpop.permute.xlu1 %895 }
 0x215   : > { %v901_v40 = vsel %vm377_vm1, %v896_v39, 0 }
 0x216   : > { %1397 = vmatmul.mubr.msk.bf16.vlgmr.msra.gmra.mrb[0].mxu1 %vm377_vm1, %v486_v35 }
 0x217   : > { %1401 = vmatpush3.bf16.xpose.msra.mxu1 %v551_v34  ;;  %1402 = vmatprep.mubr.msk.bf16.mxu1 %vm1553_vm0, %v1552_v0 }
 0x218   : > { %1412 = vmatprep.subr.bf16.mxu1 %v1552_v0  ;;  %v894_v41 = vpop.permute.xlu1 %893 }
 0x21e   : > { %1403 = vmatmul.mubr.msk.bf16.vlgmr.msra.gmra.mrb[4].mxu1 %vm377_vm1, %v544_v31 }
 0x21f   : > { %1413 = vmatpush3.bf16.xpose.msra.mxu1 %v726_v38  ;;  %1414 = vmatprep.mubr.msk.bf16.mxu1 %vm1553_vm0, %v1552_v0 }
 0x220   : > { %1424 = vmatprep.subr.bf16.mxu1 %v1552_v0 }
 0x226   : > { %1415 = vmatmul.mubr.msk.bf16.vlgmr.msra.gmra.mrb[8].mxu1 %vm377_vm1, %v719_v37 }
 0x227   : > { %1425 = vmatpush3.bf16.xpose.msra.mxu1 %v901_v40  ;;  %1426 = vmatprep.mubr.msk.bf16.mxu1 %vm1553_vm0, %v1552_v0  ;;  %v1561_v40 = vmov 3  }
 0x22e   : > { %1427 = vmatmul.mubr.msk.bf16.vlgmr.msra.gmra.mrb[12].mxu1 %vm377_vm1, %v894_v41 }
 0x2e9   : > { %v1696_v42 = vpop.f32.mrb[0].mxu1 }
 0x2ea   : > { %v1398_v43 = vpop.f32.mrb[1].mxu1 }
 0x2eb   : > { %v1698_v44 = vpop.f32.mrb[2].mxu1 }
 0x2ec   : > { %v1399_v45 = vpop.f32.mrb[3].mxu1 }
 0x2f1   : > { %v587_v46 = vpop.f32.mrb[4].mxu1 }
 0x2f2   : > { %v1701_v47 = vadd.f32 %v1634_v5, %v587_v46  ;;  %v1404_v48 = vpop.f32.mrb[5].mxu1  ;;  %v464_v46 = vsel %vm377_vm1, %v1677_v33, 0.0  ;;  %v439_v33 = vmul.f32 1.442695, %v436_v22 }
 0x2f3   : > { %v590_v49 = vpop.f32.mrb[6].mxu1  ;;  %v437_v48 = vmul.f32 1.442695, %v435_v19 }
 0x2f4   : > { %v1704_v50 = vadd.f32 %v1634_v5, %v590_v49  ;;  %v1405_v51 = vpop.f32.mrb[7].mxu1  ;;  %v596_v52 = vsel %vm377_vm1, %v1701_v47, -inf }
 0x2f5   : > { %597 = vmax.xlane.f32.xlu1 %v596_v52  ;;  %1496 = vpow2.f32 %v437_v48 }
 0x2f6   : > { %v599_v53 = vsel %vm377_vm1, %v1704_v50, -inf  ;;  %1498 = vpow2.f32 %v439_v33 }
 0x2f7   : > { %600 = vmax.xlane.f32.xlu0 %v599_v53 }
 0x2f9   : > { %v762_v54 = vpop.f32.mrb[8].mxu1 }
 0x2fa   : > { %v1711_v55 = vadd.f32 %v1634_v5, %v762_v54  ;;  %v1416_v56 = vpop.f32.mrb[9].mxu1 }
 0x2fb   : > { %v765_v57 = vpop.f32.mrb[10].mxu1 }
 0x2fc   : > { %v1714_v58 = vadd.f32 %v1634_v5, %v765_v57  ;;  %v1417_v59 = vpop.f32.mrb[11].mxu1  ;;  %v771_v60 = vsel %vm377_vm1, %v1711_v55, -inf }
 0x2fd   : > { %772 = vmax.xlane.f32.xlu0 %v771_v60 }
 0x2fe   : > { %v774_v61 = vsel %vm377_vm1, %v1714_v58, -inf }
 0x2ff   : > { %775 = vmax.xlane.f32.xlu1 %v774_v61  ;;  %v1800_v49 = vpop.eup %1496 }
 0x300   : > { %v1808_v17 = vpop.eup %1498 }
 0x301   : > { %v937_v62 = vpop.f32.mrb[12].mxu1 }
 0x302   : > { %v1721_v63 = vadd.f32 %v1634_v5, %v937_v62  ;;  %v1428_v1 = vpop.f32.mrb[13].mxu1 }
 0x303   : > { %v940_v2 = vpop.f32.mrb[14].mxu1 }
 0x304   : > { %v1724_v3 = vadd.f32 %v1634_v5, %v940_v2  ;;  %v946_v4 = vsel %vm377_vm1, %v1721_v63, -inf  ;;  %v1429_v6 = vpop.f32.mrb[15].mxu1  ;;  %v1732_v5 = vld [vmem:[#allocation2 + $0x8] sm:$0xff] }
 0x305   : > { %947 = vmax.xlane.f32.xlu0 %v946_v4 }
 0x306   : > { %v949_v8 = vsel %vm377_vm1, %v1724_v3, -inf }
 0x307   : > { %950 = vmax.xlane.f32.xlu1 %v949_v8 }
 0x382   : > { %v598_v10 = vpop.xlane.xlu1 %597 }
 0x383   : > { %v602_v11 = vmax.f32 %v594_v9, %v598_v10 }
 0x384   : > { %v601_v12 = vpop.xlane.xlu0 %600 }
 0x385   : > { %v604_v13 = vsub.f32 %v594_v9, %v602_v11  ;;  %716 = vst.msk [vmem:[#allocation2] sm:$0xff] %vm638_vm4, %v602_v11  ;;  %v1736_v16 = vmax.f32 %v1732_v5, %v601_v12  ;;  %612 = vperm.xlu0 %1474, %v602_v11  }
 0x387   : > { %v605_v20 = vsub.f32 %v1732_v5, %v1736_v16  ;;  %717 = vst.msk [vmem:[#allocation2 + $0x8] sm:$0xff] %vm638_vm4, %v1736_v16  ;;  %617 = vperm.xlu1 %1475, %v1736_v16   ;;  %v606_v15 = vmul.f32 1.442695, %v604_v13 }
 0x389   : > { %1006 = vrot.lane.b32.xlu0 %v1667_v23, %s1558_s8  ;;  %1500 = vpow2.f32 %v606_v15 }
 0x38a   : > { %v773_v24 = vpop.xlane.xlu0 %772  ;;  %1478 = vset.pattern.permute.xlu0 %v1555_v14 }
 0x38b   : > { %1476 = vset.pattern.permute.xlu1 %v1560_v25 }
 0x38c   : > { %v1747_v26 = vld [vmem:[#allocation2] sm:$0xff]  ;;  %v776_v29 = vpop.xlane.xlu1 %775 }
 0x38d   : > { %v1750_v27 = vmax.f32 %v1747_v26, %v773_v24 }
 0x38e   : > { %v1752_v28 = vld [vmem:[#allocation2 + $0x8] sm:$0xff] }
 0x38f   : > { %v779_v30 = vsub.f32 %v1747_v26, %v1750_v27  ;;  %891 = vst.msk [vmem:[#allocation2] sm:$0xff] %vm813_vm5, %v1750_v27  ;;  %v1759_v31 = vmax.f32 %v1752_v28, %v776_v29  ;;  %787 = vperm.xlu1 %1476, %v1750_v27  }
 0x391   : > { %v780_v34 = vsub.f32 %v1752_v28, %v1759_v31  ;;  %892 = vst.msk [vmem:[#allocation2 + $0x8] sm:$0xff] %vm813_vm5, %v1759_v31 }
 0x392   : > { %v948_v35 = vpop.xlane.xlu0 %947 }
 0x393   : > { %792 = vperm.xlu1 %1476, %v1759_v31   ;;  %v1811_v19 = vpop.eup %1500 }
 0x394   : > { %v951_v37 = vpop.xlane.xlu1 %950 }
 0x396   : > { %v1767_v36 = vld [vmem:[#allocation2] sm:$0xff] }
 0x397   : > { %v1770_v38 = vmax.f32 %v1767_v36, %v948_v35  ;;  %656 = vrot.lane.b32.xlu1 %v1667_v23, %s1556_s29 }
 0x398   : > { %v1774_v39 = vld [vmem:[#allocation2 + $0x8] sm:$0xff]  ;;  %1477 = vset.pattern.permute.xlu1 %v1561_v40 }
 0x399   : > { %v954_v41 = vsub.f32 %v1767_v36, %v1770_v38  ;;  %1066 = vst.msk [vmem:[#allocation2] sm:$0xff] %vm988_vm6, %v1770_v38  ;;  %v1782_v43 = vmax.f32 %v1774_v39, %v951_v37  ;;  %v458_v37 = vld [vmem:[#allocation3 + $0x8] sm:$0xff] }
 0x39b   : > { %v955_v45 = vsub.f32 %v1774_v39, %v1782_v43  ;;  %1067 = vst.msk [vmem:[#allocation2 + $0x8] sm:$0xff] %vm988_vm6, %v1782_v43  ;;  %962 = vperm.xlu1 %1477, %v1770_v38  }
 0x39d   : > { %v958_v27 = vmul.f32 1.442695, %v955_v45 }
 0x39f   : > { %967 = vperm.xlu1 %1477, %v1782_v43  }
 0x3a3   : > { %831 = vrot.lane.b32.xlu1 %v1667_v23, %s1557_s7  ;;  %v461_v23 = vsel %vm377_vm1, %v1675_v32, 0.0 }
 0x3a4   : > { %1479 = vset.pattern.permute.xlu1 %v1555_v14 }
 0x3a8   : > { %465 = vadd.xlane.f32.xlu0 %v464_v46  ;;  %v460_v46 = vmul.f32 %v1808_v17, %v458_v37 }
 0x3be   : > { %476 = vperm.xlu0 %1478, %v1800_v49  }
 0x3c7   : > { %462 = vadd.xlane.f32.xlu1 %v461_v23 }
 0x3d8   : > { %481 = vperm.xlu1 %1479, %v1808_v17   ;;  %v783_v17 = vmul.f32 1.442695, %v780_v34 }
 0x3dc   : > { %1480 = vset.pattern.permute.xlu1 %v1559_v7 }
 0x3dd   : > { %645 = vperm.xlu1 %1480, %v1811_v19  }
 0x404   : > { %v613_v51 = vpop.permute.xlu0 %612 }
 0x405   : > { %v620_v32 = vsub.f32 %v1701_v47, %v613_v51 }
 0x406   : > { %v618_v52 = vpop.permute.xlu1 %617 }
 0x407   : > { %v622_v53 = vmul.f32 1.442695, %v620_v32  ;;  %v621_v18 = vsub.f32 %v1704_v50, %v618_v52  ;;  %v608_v50 = vmul.f32 1.442695, %v605_v20  ;;  %v781_v52 = vmul.f32 1.442695, %v779_v30 }
 0x408   : > { %v1007_v20 = vpop.permute.xlu0 %1006 }
 0x409   : > { %1502 = vpow2.f32 %v622_v53  ;;  %v624_v21 = vmul.f32 1.442695, %v621_v18  ;;  %v457_v53 = vld [vmem:[#allocation3] sm:$0xff] }
 0x40a   : > { %v459_v18 = vmul.f32 %v1800_v49, %v457_v53 }
 0x40b   : > { %1504 = vpow2.f32 %v624_v21 }
 0x40e   : > { %v788_v22 = vpop.permute.xlu1 %787 }
 0x40f   : > { %v795_v54 = vsub.f32 %v1711_v55, %v788_v22 }
 0x411   : > { %v797_v62 = vmul.f32 1.442695, %v795_v54  ;;  %v473_v54 = vld [vmem:[#allocation4 + $0x8] sm:$0xff] }
 0x412   : > { %v793_v56 = vpop.permute.xlu1 %792 }
 0x413   : > { %v1503_v57 = vpop.eup %1502  ;;  %v796_v59 = vsub.f32 %v1714_v58, %v793_v56 }
 0x414   : > { %v630_v60 = vsel %vm377_vm1, %v1503_v57, 0.0 }
 0x415   : > { %v1505_v61 = vpop.eup %1504  ;;  %v799_v1 = vmul.f32 1.442695, %v796_v59  ;;  %631 = vadd.xlane.f32.xlu1 %v630_v60 }
 0x416   : > { %v657_v47 = vpop.permute.xlu1 %656  ;;  %v633_v2 = vsel %vm377_vm1, %v1505_v61, 0.0  ;;  %v655_v55 = vpack.c.bf16 %v1505_v61, %v1503_v57 }
 0x417   : > { %1506 = vpow2.f32 %v799_v1  ;;  %634 = vadd.xlane.f32.xlu0 %v633_v2  ;;  %1407 = vmatpush3.bf16.msra.mxu0 %v657_v47 }
 0x418   : > { %1418 = vmatprep.subr.bf16.mxu0 %v1552_v0  ;;  %1508 = vpow2.f32 %v797_v62 }
 0x419   : > { %1510 = vpow2.f32 %v608_v50 }
 0x41a   : > { %1409 = vmatmul.mubr.msk.bf16.vlgmr.msra.gmra.mrb[4].mxu0 %vm377_vm1, %v655_v55  ;;  %v963_v58 = vpop.permute.xlu1 %962 }
 0x41b   : > { %v970_v4 = vsub.f32 %v1721_v63, %v963_v58  ;;  %1420 = vmatprep.mubr.msk.bf16.mxu0 %vm1553_vm0, %v1552_v0 }
 0x41d   : > { %v972_v6 = vmul.f32 1.442695, %v970_v4 }
 0x41e   : > { %v968_v8 = vpop.permute.xlu1 %967 }
 0x41f   : > { %1512 = vpow2.f32 %v972_v6  ;;  %v971_v9 = vsub.f32 %v1724_v3, %v968_v8 }
 0x421   : > { %v1507_v10 = vpop.eup %1506  ;;  %v974_v11 = vmul.f32 1.442695, %v971_v9 }
 0x422   : > { %v832_v5 = vpop.permute.xlu1 %831  ;;  %v808_v12 = vsel %vm377_vm1, %v1507_v10, 0.0  ;;  %v1509_v13 = vpop.eup %1508 }
 0x423   : > { %1514 = vpow2.f32 %v974_v11  ;;  %809 = vadd.xlane.f32.xlu0 %v808_v12  ;;  %1419 = vmatpush3.bf16.msra.mxu0 %v832_v5  ;;  %v830_v16 = vpack.c.bf16 %v1507_v10, %v1509_v13  ;;  %v1511_v63 = vpop.eup %1510  ;;  %v805_v32 = vsel %vm377_vm1, %v1509_v13, 0.0 }
 0x424   : > { %1430 = vmatprep.subr.bf16.mxu0 %v1552_v0  ;;  %1516 = vpow2.f32 %v781_v52 }
 0x425   : > { %1518 = vpow2.f32 %v783_v17 }
 0x426   : > { %650 = vperm.xlu1 %1480, %v1511_v63   ;;  %1421 = vmatmul.mubr.msk.bf16.vlgmr.msra.gmra.mrb[8].mxu0 %vm377_vm1, %v830_v16 }
 0x427   : > { %1431 = vmatpush3.bf16.msra.mxu0 %v1007_v20  ;;  %1432 = vmatprep.mubr.msk.bf16.mxu0 %vm1553_vm0, %v1552_v0  ;;  %v472_v0 = vld [vmem:[#allocation4] sm:$0xff] }
 0x429   : > { %v1513_v3 = vpop.eup %1512 }
 0x42a   : > { %v980_v24 = vsel %vm377_vm1, %v1513_v3, 0.0  ;;  %1481 = vset.pattern.permute.xlu1 %v1560_v25 }
 0x42b   : > { %981 = vadd.xlane.f32.xlu0 %v980_v24 }
 0x42d   : > { %v1837_v29 = vpop.eup %1514 }
 0x42e   : > { %v1005_v35 = vpack.c.bf16 %v1837_v29, %v1513_v3  ;;  %v1517_v30 = vpop.eup %1516 }
 0x42f   : > { %v1519_v34 = vpop.eup %1518 }
 0x430   : > { %1433 = vmatmul.mubr.msk.bf16.vlgmr.msra.gmra.mrb[12].mxu0 %vm377_vm1, %v1005_v35 }
 0x435   : > { %v466_v48 = vpop.xlane.xlu0 %465 }
 0x436   : > { %v468_v23 = vadd.f32 %v466_v48, %v460_v46  ;;  %v983_v46 = vsel %vm377_vm1, %v1837_v29, 0.0 }
 0x438   : > { %471 = vst.msk [vmem:[#allocation3 + $0x8] sm:$0xff] %vm469_vm3, %v468_v23 }
 0x43d   : > { %v477_v33 = vpop.permute.xlu0 %476 }
 0x43e   : > { %v484_v15 = vmul.f32 %v477_v33, %v472_v0 }
 0x440   : > { %v537_v51 = vadd.f32 %v1696_v42, %v484_v15  ;;  %v956_v42 = vmul.f32 1.442695, %v954_v41 }
 0x442   : > { %539 = vst.msk [vmem:[#allocation4] sm:$0xff] %vm377_vm1, %v537_v51  ;;  %1520 = vpow2.f32 %v956_v42 }
 0x443   : > { %1522 = vpow2.f32 %v958_v27 }
 0x449   : > { %v641_v33 = vld [vmem:[#allocation4] sm:$0xff] }
 0x44a   : > { %806 = vadd.xlane.f32.xlu1 %v805_v32 }
 0x44c   : > { %v1521_v36 = vpop.eup %1520 }
 0x44d   : > { %v1863_v38 = vpop.eup %1522 }
 0x454   : > { %v463_v21 = vpop.xlane.xlu1 %462 }
 0x455   : > { %v467_v22 = vadd.f32 %v463_v21, %v459_v18 }
 0x457   : > { %470 = vst.msk [vmem:[#allocation3] sm:$0xff] %vm469_vm3, %v467_v22 }
 0x458   : > { %v482_v26 = vpop.permute.xlu1 %481 }
 0x459   : > { %v485_v28 = vmul.f32 %v482_v26, %v473_v54 }
 0x45b   : > { %v538_v31 = vadd.f32 %v1698_v44, %v485_v28  ;;  %820 = vperm.xlu1 %1481, %v1517_v30   ;;  %v627_v44 = vld [vmem:[#allocation3 + $0x8] sm:$0xff] }
 0x45c   : > { %v1867_v39 = vpop.permute.xlu1 %645  ;;  %v629_v56 = vmul.f32 %v1511_v63, %v627_v44 }
 0x45d   : > { %540 = vst.msk [vmem:[#allocation4 + $0x8] sm:$0xff] %vm377_vm1, %v538_v31 }
 0x45e   : > { %v626_v41 = vld [vmem:[#allocation3] sm:$0xff] }
 0x45f   : > { %825 = vperm.xlu1 %1481, %v1519_v34   ;;  %v628_v43 = vmul.f32 %v1811_v19, %v626_v41 }
 0x463   : > { %1482 = vset.pattern.permute.xlu1 %v1561_v40 }
 0x464   : > { %995 = vperm.xlu1 %1482, %v1521_v36   ;;  %v642_v51 = vld [vmem:[#allocation4 + $0x8] sm:$0xff] }
 0x468   : > { %1000 = vperm.xlu1 %1482, %v1863_v38  }
 0x46c   : > { %1483 = vset.pattern.permute.xlu1 %v1555_v14 }
 0x4a2   : > { %v632_v45 = vpop.xlane.xlu1 %631 }
 0x4a3   : > { %v636_v49 = vadd.f32 %v632_v45, %v628_v43 }
 0x4a4   : > { %v635_v57 = vpop.xlane.xlu0 %634 }
 0x4a5   : > { %639 = vst.msk [vmem:[#allocation3] sm:$0xff] %vm638_vm4, %v636_v49  ;;  %v637_v59 = vadd.f32 %v635_v57, %v629_v56 }
 0x4a6   : > { %v651_v14 = vpop.permute.xlu1 %650 }
 0x4a7   : > { %640 = vst.msk [vmem:[#allocation3 + $0x8] sm:$0xff] %vm638_vm4, %v637_v59  ;;  %v654_v52 = vmul.f32 %v651_v14, %v642_v51 }
 0x4ac   : > { %v801_v47 = vld [vmem:[#allocation3] sm:$0xff] }
 0x4ad   : > { %v803_v2 = vmul.f32 %v1517_v30, %v801_v47 }
 0x4ae   : > { %v802_v60 = vld [vmem:[#allocation3 + $0x8] sm:$0xff] }
 0x4af   : > { %v804_v61 = vmul.f32 %v1519_v34, %v802_v60 }
 0x4b0   : > { %v810_v62 = vpop.xlane.xlu0 %809 }
 0x4b1   : > { %v812_v1 = vadd.f32 %v810_v62, %v804_v61 }
 0x4b3   : > { %815 = vst.msk [vmem:[#allocation3 + $0x8] sm:$0xff] %vm813_vm5, %v812_v1 }
 0x4b8   : > { %v982_v4 = vpop.xlane.xlu0 %981 }
 0x4d7   : > { %v807_v50 = vpop.xlane.xlu1 %806 }
 0x4d8   : > { %v811_v19 = vadd.f32 %v807_v50, %v803_v2 }
 0x4da   : > { %814 = vst.msk [vmem:[#allocation3] sm:$0xff] %vm813_vm5, %v811_v19 }
 0x4db   : > { %v821_v48 = vpop.permute.xlu1 %820 }
 0x4df   : > { %v826_v23 = vpop.permute.xlu1 %825 }
 0x4e1   : > { %v976_v55 = vld [vmem:[#allocation3] sm:$0xff] }
 0x4e2   : > { %v978_v58 = vmul.f32 %v1521_v36, %v976_v55 }
 0x4e3   : > { %v996_v0 = vpop.permute.xlu1 %995 }
 0x4e4   : > { %v986_v6 = vadd.f32 %v982_v4, %v978_v58 }
 0x4e6   : > { %989 = vst.msk [vmem:[#allocation3] sm:$0xff] %vm988_vm6, %v986_v6 }
 0x4e7   : > { %v1001_v15 = vpop.permute.xlu1 %1000 }
 0x4ed   : > { %v696_v8 = vpop.f32.mrb[4].mxu0  ;;  %v1071_v9 = vld [vmem:[#allocation3] sm:$0xff] }
 0x4ee   : > { %705 = vrot.lane.b32.xlu0 %v696_v8, %s1562_s9  ;;  %v1410_v10 = vpop.f32.mrb[5].mxu0  ;;  %1524 = vrcp.f32 %v1071_v9 }
 0x4ef   : > { %v699_v11 = vpop.f32.mrb[6].mxu0 }
 0x4f0   : > { %707 = vrot.lane.b32.xlu1 %v699_v11, %s1562_s9  ;;  %v1411_v5 = vpop.f32.mrb[7].mxu0 }
 0x4f8   : > { %v1875_v12 = vpop.eup %1524 }
 0x4f9   : > { %1079 = vperm.xlu1 %1483, %v1875_v12   ;;  %v871_v13 = vpop.f32.mrb[8].mxu0 }
 0x4fa   : > { %v1422_v16 = vpop.f32.mrb[9].mxu0 }
 0x4fb   : > { %v874_v20 = vpop.f32.mrb[10].mxu0 }
 0x4fc   : > { %v1423_v63 = vpop.f32.mrb[11].mxu0 }
 0x4fd   : > { %1484 = vset.pattern.permute.xlu1 %v1559_v7 }
 0x4fe   : > { %1108 = vperm.xlu1 %1484, %v1875_v12  }
 0x502   : > { %882 = vrot.lane.b32.xlu1 %v874_v20, %s1563_s10 }
 0x503   : > { %v1046_v3 = vpop.f32.mrb[12].mxu0  ;;  %1486 = vset.pattern.permute.xlu1 %v1560_v25  ;;  %v653_v25 = vmul.f32 %v1867_v39, %v641_v33  ;;  %v977_v39 = vld [vmem:[#allocation3 + $0x8] sm:$0xff] }
 0x504   : > { %v1434_v24 = vpop.f32.mrb[13].mxu0  ;;  %v979_v41 = vmul.f32 %v1863_v38, %v977_v39 }
 0x505   : > { %v1049_v35 = vpop.f32.mrb[14].mxu0 }
 0x506   : > { %1137 = vperm.xlu1 %1486, %v1875_v12   ;;  %v1435_v37 = vpop.f32.mrb[15].mxu0 }
 0x50a   : > { %1055 = vrot.lane.b32.xlu1 %v1046_v3, %s1564_s11 }
 0x50d   : > { %984 = vadd.xlane.f32.xlu0 %v983_v46 }
 0x50e   : > { %1057 = vrot.lane.b32.xlu1 %v1049_v35, %s1564_s11 }
 0x523   : > { %880 = vrot.lane.b32.xlu0 %v871_v13, %s1563_s10 }
 0x560   : > { %v706_v32 = vpop.permute.xlu0 %705 }
 0x561   : > { %v711_v17 = vadd.f32 %v706_v32, %v653_v25 }
 0x562   : > { %v708_v53 = vpop.permute.xlu1 %707 }
 0x563   : > { %714 = vst.msk [vmem:[#allocation4] sm:$0xff] %vm713_vm8, %v711_v17  ;;  %v712_v18 = vadd.f32 %v708_v53, %v654_v52 }
 0x565   : > { %715 = vst.msk [vmem:[#allocation4 + $0x8] sm:$0xff] %vm713_vm8, %v712_v18 }
 0x56a   : > { %v816_v43 = vld [vmem:[#allocation4] sm:$0xff] }
 0x56b   : > { %v828_v49 = vmul.f32 %v821_v48, %v816_v43 }
 0x56c   : > { %v817_v42 = vld [vmem:[#allocation4 + $0x8] sm:$0xff] }
 0x56d   : > { %v829_v22 = vmul.f32 %v826_v23, %v817_v42 }
 0x578   : > { %v1080_v29 = vpop.permute.xlu1 %1079 }
 0x57d   : > { %v1109_v21 = vpop.permute.xlu1 %1108 }
 0x581   : > { %v883_v54 = vpop.permute.xlu1 %882 }
 0x582   : > { %v887_v26 = vadd.f32 %v883_v54, %v829_v22 }
 0x584   : > { %890 = vst.msk [vmem:[#allocation4 + $0x8] sm:$0xff] %vm888_vm9, %v887_v26 }
 0x585   : > { %v1138_v27 = vpop.permute.xlu1 %1137 }
 0x589   : > { %v1056_v28 = vpop.permute.xlu1 %1055 }
 0x58b   : > { %v992_v30 = vld [vmem:[#allocation4 + $0x8] sm:$0xff] }
 0x58c   : > { %v1004_v31 = vmul.f32 %v1001_v15, %v992_v30 }
 0x58d   : > { %v1058_v34 = vpop.permute.xlu1 %1057 }
 0x58e   : > { %v1062_v36 = vadd.f32 %v1058_v34, %v1004_v31 }
 0x590   : > { %1065 = vst.msk [vmem:[#allocation4 + $0x8] sm:$0xff] %vm1063_vm10, %v1062_v36 }
 0x597   : > { %v1076_v58 = vld [vmem:[#allocation4 + $0x8] sm:$0xff] }
 0x59a   : > { %v985_v44 = vpop.xlane.xlu0 %984 }
 0x59b   : > { %v987_v45 = vadd.f32 %v985_v44, %v979_v41 }
 0x59d   : > { %990 = vst.msk [vmem:[#allocation3 + $0x8] sm:$0xff] %vm988_vm6, %v987_v45 }
 0x59e   : > { %v881_v56 = vpop.permute.xlu0 %880 }
 0x59f   : > { %v886_v57 = vadd.f32 %v881_v56, %v828_v49 }
 0x5a1   : > { %889 = vst.msk [vmem:[#allocation4] sm:$0xff] %vm888_vm9, %v886_v57 }
 0x5a4   : > { %v1072_v59 = vld [vmem:[#allocation3 + $0x8] sm:$0xff] }
 0x5a5   : > { %1526 = vrcp.f32 %v1072_v59 }
 0x5a8   : > { %v991_v60 = vld [vmem:[#allocation4] sm:$0xff] }
 0x5a9   : > { %v1003_v61 = vmul.f32 %v996_v0, %v991_v60 }
 0x5ab   : > { %v1061_v62 = vadd.f32 %v1056_v28, %v1003_v61 }
 0x5ad   : > { %1064 = vst.msk [vmem:[#allocation4] sm:$0xff] %vm1063_vm10, %v1061_v62 }
 0x5af   : > { %v1527_v1 = vpop.eup %1526 }
 0x5b0   : > { %1084 = vperm.xlu0 %1478, %v1527_v1   ;;  %1142 = vperm.xlu1 %1486, %v1527_v1  }
 0x5b4   : > { %1485 = vset.pattern.permute.xlu0 %v1559_v7  ;;  %1488 = vset.pattern.permute.xlu1 %v1561_v40  ;;  %v1075_v38 = vld [vmem:[#allocation4] sm:$0xff] }
 0x5b5   : > { %1113 = vperm.xlu0 %1485, %v1527_v1   ;;  %1171 = vperm.xlu1 %1488, %v1527_v1   ;;  %v1087_v14 = vmul.f32 %v1080_v29, %v1075_v38  ;;  %v1116_v47 = vmul.f32 %v1109_v21, %v1075_v38  ;;  %v1145_v2 = vmul.f32 %v1138_v27, %v1075_v38 }
 0x5b7   : > { %v1364_v50 = vpack.c.bf16 %v1087_v14, %v1087_v14  ;;  %v1366_v7 = vpack.c.bf16 %v1116_v47, %v1116_v47  ;;  %v1368_v19 = vpack.c.bf16 %v1145_v2, %v1145_v2 }
 0x5b9   : > { %1487 = vset.pattern.permute.xlu0 %v1561_v40  ;;  %1098 = vst.msk [vmem:[%s1897_s14] sm:$0xf] %vm1097_vm11, %v1364_v50 }
 0x5ba   : > { %1166 = vperm.xlu0 %1487, %v1875_v12   ;;  %1127 = vst.msk [vmem:[%s1897_s14] sm:$0xf] %vm1126_vm12, %v1366_v7 }
 0x5bb   : > { %1156 = vst.msk [vmem:[%s1897_s14] sm:$0xf] %vm1155_vm13, %v1368_v19 }
 0x62f   : > { %v1085_v55 = vpop.permute.xlu0 %1084  ;;  %v1143_v4 = vpop.permute.xlu1 %1142 }
 0x630   : > { %v1088_v6 = vmul.f32 %v1085_v55, %v1076_v58  ;;  %v1146_v40 = vmul.f32 %v1143_v4, %v1076_v58 }
 0x632   : > { %v1365_v8 = vpack.c.bf16 %v1088_v6, %v1088_v6  ;;  %v1369_v13 = vpack.c.bf16 %v1146_v40, %v1146_v40 }
 0x634   : > { %1099 = vst.msk [vmem:[%s1897_s14 + $0x4] sm:$0xf] %vm1097_vm11, %v1365_v8  ;;  %v1114_v9 = vpop.permute.xlu0 %1113  ;;  %v1172_v10 = vpop.permute.xlu1 %1171 }
 0x635   : > { %v1117_v11 = vmul.f32 %v1114_v9, %v1076_v58  ;;  %v1175_v5 = vmul.f32 %v1172_v10, %v1076_v58 }
 0x637   : > { %v1367_v12 = vpack.c.bf16 %v1117_v11, %v1117_v11  ;;  %v1371_v16 = vpack.c.bf16 %v1175_v5, %v1175_v5 }
 0x639   : > { %1128 = vst.msk [vmem:[%s1897_s14 + $0x4] sm:$0xf] %vm1126_vm12, %v1367_v12  ;;  %v1167_v20 = vpop.permute.xlu0 %1166 }
 0x63a   : > { %1157 = vst.msk [vmem:[%s1897_s14 + $0x4] sm:$0xf] %vm1155_vm13, %v1369_v13  ;;  %v1174_v63 = vmul.f32 %v1167_v20, %v1075_v38 }
 0x63b   : > { %1186 = vst.msk [vmem:[%s1897_s14 + $0x4] sm:$0xf] %vm1184_vm14, %v1371_v16 }
 0x63c   : > { %v1370_v3 = vpack.c.bf16 %v1174_v63, %v1174_v63 }
 0x63e   : > { %1185 = vst.msk [vmem:[%s1897_s14] sm:$0xf] %vm1184_vm14, %v1370_v3 }
 0x63f PF: > { %s14_s17 = sadd.s32 1, %s1550_s17   ;;  %s1929_s15 = smov %s1546_s16 }
 0x640   : > { %p11_p5 = scmp.ge.s32.totalorder %s14_s17, 4   ;;  %s1930_s16 = smov %s1932_s18 }
 0x642   :  { %13 = sbr.rel (!%p11_p5) target bundleno = 2 (0x2), region = 83 }

// kernel: transformer_encoder.21
= control target key start
LH: loop header
LB: loop body
LE: loop exit
PB: predicated region body
PF: predicated region fallthrough
CT: control target
= control target key end

     0   :  { %vm20_vm0 = vcmask 523264   ;;  %s174_s0 = inlined_call_operand.vmem [shape: f32[32,64], index: 0, kind: input, shape index: {}]   ;;  %s175_s1 = inlined_call_operand.vmem [shape: f32[1,64], index: 1, kind: input, shape index: {}]   ;;  %s176_s2 = inlined_call_operand.vmem [shape: f32[1,64], index: 2, kind: input, shape index: {}]   ;;  %s177_s3 = inlined_call_operand.vmem [shape: f32[32,64], index: 3, kind: output, shape index: {}]  }
   0x1   :  { %v14_v0 = vld [vmem:[%s174_s0] sm:$0xff]  ;;  %v16_v1 = vld [vmem:[%s174_s0 + $0x10] sm:$0xff]  ;;  %v15_v2 = vld [vmem:[%s174_s0 + $0x8] sm:$0xff] }
   0x2   :  { %v21_v3 = vsel %vm20_vm0, %v14_v0, 0.0  ;;  %v27_v4 = vsel %vm20_vm0, %v16_v1, 0.0  ;;  %v17_v5 = vld [vmem:[%s174_s0 + $0x18] sm:$0xff]  ;;  %v24_v6 = vsel %vm20_vm0, %v15_v2, 0.0  ;;  %v102_v41 = vld [vmem:[%s175_s1] ss:$0 sm:$0xff] }
   0x3   :  { %22 = vadd.xlane.f32.xlu0 %v21_v3  ;;  %28 = vadd.xlane.f32.xlu1 %v27_v4  ;;  %v30_v7 = vsel %vm20_vm0, %v17_v5, 0.0  ;;  %v103_v43 = vld [vmem:[%s176_s2] ss:$0 sm:$0xff] }
   0x7   :  { %25 = vadd.xlane.f32.xlu0 %v24_v6  ;;  %31 = vadd.xlane.f32.xlu1 %v30_v7 }
  0x90   :  { %v23_v8 = vpop.xlane.xlu0 %22  ;;  %v29_v9 = vpop.xlane.xlu1 %28 }
  0x91   :  { %v34_v10 = vmul.f32 0.015625, %v23_v8  ;;  %v36_v11 = vmul.f32 0.015625, %v29_v9 }
  0x93   :  { %v38_v12 = vsub.f32 %v14_v0, %v34_v10  ;;  %v40_v13 = vsub.f32 %v16_v1, %v36_v11 }
  0x94   :  { %v26_v14 = vpop.xlane.xlu0 %25  ;;  %v32_v15 = vpop.xlane.xlu1 %31 }
  0x95   :  { %v35_v16 = vmul.f32 0.015625, %v26_v14  ;;  %v37_v17 = vmul.f32 0.015625, %v32_v15  ;;  %v42_v18 = vmul.f32 %v38_v12, %v38_v12  ;;  %v44_v19 = vmul.f32 %v40_v13, %v40_v13 }
  0x97   :  { %v39_v20 = vsub.f32 %v15_v2, %v35_v16  ;;  %v41_v21 = vsub.f32 %v17_v5, %v37_v17  ;;  %v46_v22 = vsel %vm20_vm0, %v42_v18, 0.0  ;;  %v52_v23 = vsel %vm20_vm0, %v44_v19, 0.0 }
  0x98   :  { %47 = vadd.xlane.f32.xlu0 %v46_v22 }
  0x99   :  { %v43_v24 = vmul.f32 %v39_v20, %v39_v20  ;;  %v45_v25 = vmul.f32 %v41_v21, %v41_v21 }
  0x9b   :  { %v49_v26 = vsel %vm20_vm0, %v43_v24, 0.0  ;;  %v55_v27 = vsel %vm20_vm0, %v45_v25, 0.0 }
  0x9c   :  { %53 = vadd.xlane.f32.xlu0 %v52_v23  ;;  %50 = vadd.xlane.f32.xlu1 %v49_v26 }
  0xa0   :  { %56 = vadd.xlane.f32.xlu1 %v55_v27 }
 0x125   :  { %v48_v28 = vpop.xlane.xlu0 %47 }
 0x126   :  { %v58_v29 = vmul.f32 0.015625, %v48_v28 }
 0x128   :  { %v62_v30 = vadd.f32 1e-05, %v58_v29 }
 0x129   :  { %v51_v31 = vpop.xlane.xlu1 %50  ;;  %v54_v32 = vpop.xlane.xlu0 %53 }
 0x12a   :  { %104 = vrsqrt.f32 %v62_v30  ;;  %v59_v33 = vmul.f32 0.015625, %v51_v31  ;;  %v60_v34 = vmul.f32 0.015625, %v54_v32 }
 0x12c   :  { %v63_v35 = vadd.f32 1e-05, %v59_v33  ;;  %v64_v36 = vadd.f32 1e-05, %v60_v34 }
 0x12d   :  { %v57_v37 = vpop.xlane.xlu1 %56 }
 0x12e   :  { %106 = vrsqrt.f32 %v63_v35  ;;  %v61_v38 = vmul.f32 0.015625, %v57_v37 }
 0x12f   :  { %108 = vrsqrt.f32 %v64_v36 }
 0x130   :  { %v65_v39 = vadd.f32 1e-05, %v61_v38 }
 0x132   :  { %110 = vrsqrt.f32 %v65_v39 }
 0x134   :  { %v105_v40 = vpop.eup %104 }
 0x135   :  { %v70_v42 = vmul.f32 %v105_v40, %v38_v12 }
 0x137   :  { %v80_v44 = vmul.f32 %v102_v41, %v70_v42 }
 0x138   :  { %v107_v45 = vpop.eup %106 }
 0x139   :  { %v109_v46 = vpop.eup %108  ;;  %v90_v47 = vadd.f32 %v103_v43, %v80_v44  ;;  %v71_v48 = vmul.f32 %v107_v45, %v39_v20 }
 0x13a   :  { %v72_v49 = vmul.f32 %v109_v46, %v40_v13 }
 0x13b   :  { %94 = vst.msk [vmem:[%s177_s3] sm:$0xff] %vm20_vm0, %v90_v47  ;;  %v81_v50 = vmul.f32 %v102_v41, %v71_v48 }
 0x13c   :  { %v111_v51 = vpop.eup %110  ;;  %v82_v52 = vmul.f32 %v102_v41, %v72_v49 }
 0x13d   :  { %v91_v53 = vadd.f32 %v103_v43, %v81_v50  ;;  %v73_v54 = vmul.f32 %v111_v51, %v41_v21 }
 0x13e   :  { %v92_v55 = vadd.f32 %v103_v43, %v82_v52 }
 0x13f   :  { %95 = vst.msk [vmem:[%s177_s3 + $0x8] sm:$0xff] %vm20_vm0, %v91_v53  ;;  %v83_v56 = vmul.f32 %v102_v41, %v73_v54 }
 0x140   :  { %96 = vst.msk [vmem:[%s177_s3 + $0x10] sm:$0xff] %vm20_vm0, %v92_v55 }
 0x141   :  { %v93_v57 = vadd.f32 %v103_v43, %v83_v56 }
 0x143   :  { %97 = vst.msk [vmem:[%s177_s3 + $0x18] sm:$0xff] %vm20_vm0, %v93_v57 }

// kernel: transformer_encoder.15
= control target key start
LH: loop header
LB: loop body
LE: loop exit
PB: predicated region body
PF: predicated region fallthrough
CT: control target
= control target key end

     0   :  { %vm234_vm0 = vcmask 523264   ;;  %s442_s1 = inlined_call_operand.vmem [shape: bf16[256,64], index: 1, kind: input, shape index: {}]   ;;  %s443_s0 = inlined_call_operand.vmem [shape: bf16[32,256], index: 0, kind: input, shape index: {}]   ;;  %s444_s2 = inlined_call_operand.vmem [shape: f32[1,64], index: 2, kind: input, shape index: {}]   ;;  %s445_s3 = inlined_call_operand.vmem [shape: f32[32,64], index: 3, kind: input, shape index: {}]   ;;  %s446_s4 = inlined_call_operand.vmem [shape: f32[32,64], index: 4, kind: output, shape index: {}]  }
   0x1   :  { %v308_v0 = vld [vmem:[%s442_s1 + $0x40] sm:$0xff]   ;;  %v310_v2 = vld [vmem:[%s442_s1 + $0x48] sm:$0xff]   ;;  %v312_v4 = vld [vmem:[%s442_s1 + $0x50] sm:$0xff]  }
   0x2   :  { %v309_v1 = vld [vmem:[%s442_s1] sm:$0xff]   ;;  %264 = vmatprep.subr.bf16.mxu0 %v308_v0  ;;  %292 = vmatprep.subr.bf16.mxu1 %v308_v0  ;;  %v311_v3 = vld [vmem:[%s442_s1 + $0x8] sm:$0xff]   ;;  %v313_v5 = vld [vmem:[%s442_s1 + $0x10] sm:$0xff]  }
   0x3   :  { %265 = vmatpush3.bf16.msra.mxu0 %v309_v1  ;;  %300 = vmatpush3.bf16.msra.mxu1 %v309_v1  ;;  %v314_v6 = vld [vmem:[%s442_s1 + $0x58] sm:$0xff]   ;;  %v316_v8 = vld [vmem:[%s442_s1 + $0x60] sm:$0xff]   ;;  %v318_v10 = vld [vmem:[%s442_s1 + $0x68] sm:$0xff]  }
   0x4   :  { %266 = vmatprep.subr.bf16.mxu0 %v310_v2  ;;  %293 = vmatprep.subr.bf16.mxu1 %v310_v2  ;;  %v315_v7 = vld [vmem:[%s442_s1 + $0x18] sm:$0xff]   ;;  %v317_v9 = vld [vmem:[%s442_s1 + $0x20] sm:$0xff]   ;;  %v319_v13 = vld [vmem:[%s442_s1 + $0x28] sm:$0xff]  }
   0x5   :  { %v326_v11 = vld [vmem:[%s443_s0 + $0x4] ss:$8 sps:$4 sm:$0xff]   ;;  %v329_v12 = vld [vmem:[%s443_s0 + $0x14] ss:$8 sps:$4 sm:$0xff]   ;;  %v324_v18 = vld [vmem:[%s443_s0] ss:$8 sps:$4 sm:$0xff]  }
   0x6   :  { %v320_v14 = vld [vmem:[%s442_s1 + $0x70] sm:$0xff]   ;;  %209 = vmatprep.mubr.bf16.mxu0 %v326_v11  ;;  %217 = vmatprep.mubr.bf16.mxu1 %v329_v12  ;;  %v322_v16 = vld [vmem:[%s442_s1 + $0x78] sm:$0xff]   ;;  %v243_v22 = vld [vmem:[%s444_s2] ss:$0 sm:$0xff] }
   0x7   :  { %267 = vmatpush3.bf16.msra.mxu0 %v311_v3  ;;  %301 = vmatpush3.bf16.msra.mxu1 %v311_v3  ;;  %v321_v15 = vld [vmem:[%s442_s1 + $0x30] sm:$0xff]   ;;  %v323_v17 = vld [vmem:[%s442_s1 + $0x38] sm:$0xff]   ;;  %v226_v29 = vld [vmem:[%s445_s3] sm:$0xff] }
   0x8   :  { %268 = vmatprep.subr.bf16.mxu0 %v312_v4  ;;  %294 = vmatprep.subr.bf16.mxu1 %v312_v4  ;;  %v327_v19 = vld [vmem:[%s443_s0 + $0x10] ss:$8 sps:$4 sm:$0xff]   ;;  %v227_v37 = vld [vmem:[%s445_s3 + $0x8] sm:$0xff] }
   0x9   :  { %v228_v30 = vld [vmem:[%s445_s3 + $0x10] sm:$0xff]  ;;  %v229_v38 = vld [vmem:[%s445_s3 + $0x18] sm:$0xff] }
   0xb   :  { %269 = vmatpush3.bf16.msra.mxu0 %v313_v5  ;;  %302 = vmatpush3.bf16.msra.mxu1 %v313_v5 }
   0xc   :  { %270 = vmatprep.subr.bf16.mxu0 %v314_v6  ;;  %295 = vmatprep.subr.bf16.mxu1 %v314_v6 }
   0xf   :  { %271 = vmatpush3.bf16.msra.mxu0 %v315_v7  ;;  %303 = vmatpush3.bf16.msra.mxu1 %v315_v7 }
  0x10   :  { %272 = vmatprep.subr.bf16.mxu0 %v316_v8  ;;  %296 = vmatprep.subr.bf16.mxu1 %v316_v8 }
  0x13   :  { %273 = vmatpush3.bf16.msra.mxu0 %v317_v9  ;;  %304 = vmatpush3.bf16.msra.mxu1 %v317_v9 }
  0x14   :  { %274 = vmatprep.subr.bf16.mxu0 %v318_v10  ;;  %297 = vmatprep.subr.bf16.mxu1 %v318_v10 }
  0x17   :  { %275 = vmatpush3.bf16.msra.mxu0 %v319_v13  ;;  %305 = vmatpush3.bf16.msra.mxu1 %v319_v13 }
  0x18   :  { %276 = vmatprep.subr.bf16.mxu0 %v320_v14  ;;  %298 = vmatprep.subr.bf16.mxu1 %v320_v14 }
  0x1b   :  { %277 = vmatpush3.bf16.msra.mxu0 %v321_v15  ;;  %306 = vmatpush3.bf16.msra.mxu1 %v321_v15 }
  0x1c   :  { %278 = vmatprep.subr.bf16.mxu0 %v322_v16  ;;  %299 = vmatprep.subr.bf16.mxu1 %v322_v16 }
  0x1f   :  { %279 = vmatpush3.bf16.msra.mxu0 %v323_v17  ;;  %307 = vmatpush3.bf16.msra.mxu1 %v323_v17 }
  0x22   :  { %210 = vmatmul.mubr.bf16.vlgmr.msra.gmra.mrb[0].mxu0 %v324_v18  ;;  %218 = vmatmul.mubr.bf16.vlgmr.msra.gmra.mrb[0].mxu1 %v327_v19 }
  0xf5   :  { %v280_v20 = vpop.f32.mrb[0].mxu0  ;;  %v286_v21 = vpop.f32.mrb[0].mxu1 }
  0xf6   :  { %v281_v23 = vpop.f32.mrb[1].mxu0  ;;  %v287_v24 = vpop.f32.mrb[1].mxu1 }
  0xf7   :  { %v282_v25 = vadd.f32 %v281_v23, %v280_v20  ;;  %v288_v26 = vadd.f32 %v287_v24, %v286_v21  ;;  %v283_v27 = vpop.f32.mrb[2].mxu0  ;;  %v289_v28 = vpop.f32.mrb[2].mxu1 }
  0xf8   :  { %v284_v31 = vpop.f32.mrb[3].mxu0  ;;  %v290_v32 = vpop.f32.mrb[3].mxu1 }
  0xf9   :  { %v212_v33 = vadd.f32 %v282_v25, %v243_v22  ;;  %v220_v34 = vadd.f32 %v288_v26, %v243_v22  ;;  %v285_v35 = vadd.f32 %v284_v31, %v283_v27  ;;  %v291_v36 = vadd.f32 %v290_v32, %v289_v28 }
  0xfb   :  { %v230_v39 = vadd.f32 %v226_v29, %v212_v33  ;;  %v232_v40 = vadd.f32 %v228_v30, %v220_v34  ;;  %v215_v41 = vadd.f32 %v285_v35, %v243_v22  ;;  %v223_v42 = vadd.f32 %v291_v36, %v243_v22 }
  0xfd   :  { %235 = vst.msk [vmem:[%s446_s4] sm:$0xff] %vm234_vm0, %v230_v39  ;;  %237 = vst.msk [vmem:[%s446_s4 + $0x10] sm:$0xff] %vm234_vm0, %v232_v40  ;;  %v231_v43 = vadd.f32 %v227_v37, %v215_v41  ;;  %v233_v44 = vadd.f32 %v229_v38, %v223_v42 }
  0xff   :  { %236 = vst.msk [vmem:[%s446_s4 + $0x8] sm:$0xff] %vm234_vm0, %v231_v43  ;;  %238 = vst.msk [vmem:[%s446_s4 + $0x18] sm:$0xff] %vm234_vm0, %v233_v44 }

</bundles_post_ra>
